<compile_context>
chip_gen: v7x
topology: tpu7x:2x2x1
jax: 0.10.0
libtpu: 0.0.40
codegen_flags: <defaults>
</compile_context>

<pallas_src>
import jax
import jax.numpy as jnp
from jax import lax
from jax.experimental import pallas as pl
from jax.experimental.pallas import tpu as pltpu


# dot_general dimension numbers
_NT = (((1,), (1,)), ((), ()))   # (M, K) x (N, K) -> (M, N)
_TN = (((0,), (0,)), ((), ()))   # (K, M) x (K, N) -> (M, N)   (lhs transposed)


# ----------------------------------------------------------------------------
# Fused AMAP kernel (one batch element per grid step)
# ----------------------------------------------------------------------------
def _amap_kernel(x_ref, tp_ref, wqk_ref, wv_ref, bv_ref, wt_ref, bt_ref,
                 s_ref, b_ref, xo_ref, tpo_ref, a1_ref, a2_ref):
    x = x_ref[0]          # (N, C)  channel-last
    tp = tp_ref[0]        # (N, C)
    wqk = wqk_ref[...]    # (C, C//4)  shared q_conv / k_conv weight (no bias)
    wv = wv_ref[...]      # (C, C)
    bv = bv_ref[...]      # (1, C)
    wt = wt_ref[...]      # (C, C)
    bt = bt_ref[...]      # (1, C)
    s = s_ref[...]        # (1, C)  folded BN scale
    b = b_ref[...]        # (1, C)  folded BN bias

    # Shared q/k projection: compute once per cloud, reuse for both energies.
    xq = jnp.dot(x, wqk, preferred_element_type=jnp.float32)     # (N, Cq)
    tpq = jnp.dot(tp, wqk, preferred_element_type=jnp.float32)   # (N, Cq)

    # energy1[i, j] = <q(x)_i, k(tp)_j>;  energy2[i, j] = <q(tp)_i, k(x)_j>
    e1 = lax.dot_general(xq, tpq, _NT, preferred_element_type=jnp.float32)
    e2 = lax.dot_general(tpq, xq, _NT, preferred_element_type=jnp.float32)

    def attention(e):
        # softmax over the last axis, then renormalise each column by its sum
        # over rows (torch: attn / (1e-9 + attn.sum(dim=1, keepdim=True))).
        m = jnp.max(e, axis=-1, keepdims=True)
        p = jnp.exp(e - m)
        a = p / jnp.sum(p, axis=-1, keepdims=True)
        return a / (1e-9 + jnp.sum(a, axis=0, keepdims=True))

    a1 = attention(e1)
    a2 = attention(e2)

    def branch(src, base, a):
        # v = v_conv(src); r[j, :] = sum_i a[i, j] * v[i, :]   (== a^T @ v)
        v = jnp.dot(src, wv, preferred_element_type=jnp.float32) + bv
        r = lax.dot_general(a, v, _TN, preferred_element_type=jnp.float32)
        t = jnp.dot(src - r, wt, preferred_element_type=jnp.float32) + bt
        t = jnp.maximum(t * s + b, 0.0)       # folded BatchNorm (eval) + ReLU
        return base + t

    # x    = x    + act(bn(trans_conv(tp_x - v(tp_x) @ A1)))
    x_new = branch(tp, x, a1)
    # tp_x = tp_x + act(bn(trans_conv(x'   - v(x')   @ A2)))   (x' = updated x)
    tp_new = branch(x_new, tp, a2)

    xo_ref[0] = x_new
    tpo_ref[0] = tp_new
    a1_ref[0] = a1
    a2_ref[0] = a2


def amap_layer(x_bnc, tp_bnc, p):
    """x_bnc, tp_bnc: (B, N, C) channel-last inputs."""
    B, N, C = x_bnc.shape
    Cq = p["wqk"].shape[1]
    const2 = lambda b: (0, 0)
    bn_map = lambda b: (b, 0, 0)
    return pl.pallas_call(
        _amap_kernel,
        out_shape=(
            jax.ShapeDtypeStruct((B, N, C), jnp.float32),   # x out
            jax.ShapeDtypeStruct((B, N, C), jnp.float32),   # tp_x out
            jax.ShapeDtypeStruct((B, N, N), jnp.float32),   # attention1
            jax.ShapeDtypeStruct((B, N, N), jnp.float32),   # attention2
        ),
        grid=(B,),
        in_specs=[
            pl.BlockSpec((1, N, C), bn_map),
            pl.BlockSpec((1, N, C), bn_map),
            pl.BlockSpec((C, Cq), const2),    # shared q/k weight (resident)
            pl.BlockSpec((C, C), const2),     # v_conv weight
            pl.BlockSpec((1, C), const2),     # v_conv bias
            pl.BlockSpec((C, C), const2),     # trans_conv weight
            pl.BlockSpec((1, C), const2),     # trans_conv bias
            pl.BlockSpec((1, C), const2),     # folded BN scale
            pl.BlockSpec((1, C), const2),     # folded BN bias
        ],
        out_specs=(
            pl.BlockSpec((1, N, C), bn_map),
            pl.BlockSpec((1, N, C), bn_map),
            pl.BlockSpec((1, N, N), bn_map),
            pl.BlockSpec((1, N, N), bn_map),
        ),
        compiler_params=pltpu.CompilerParams(
            dimension_semantics=("parallel",)),
    )(x_bnc, tp_bnc, p["wqk"], p["wv"], p["bv"], p["wt"], p["bt"],
      p["s"], p["b"])


# ----------------------------------------------------------------------------
# Wrapper matching the PyTorch (B, C, N) layout
# ----------------------------------------------------------------------------
def amap_forward(x, tp_x, params):
    x_bnc = jnp.transpose(x, (0, 2, 1)).astype(jnp.float32)
    tp_bnc = jnp.transpose(tp_x, (0, 2, 1)).astype(jnp.float32)
    xo, tpo, a1, a2 = amap_layer(x_bnc, tp_bnc, params)
    return (jnp.transpose(xo, (0, 2, 1)),
            jnp.transpose(tpo, (0, 2, 1)),
            a1, a2)


# ----------------------------------------------------------------------------
# Deterministic parameter construction (weights stored transposed: x @ W)
# ----------------------------------------------------------------------------
def make_params(key, channels):
    c = channels
    cq = c // 4
    ks = jax.random.split(key, 10)

    def weight(k, cin, cout):
        w = jax.random.normal(k, (cout, cin)) / jnp.sqrt(cin)
        return jnp.transpose(w).astype(jnp.float32)

    wqk = weight(ks[0], c, cq)            # shared q_conv / k_conv, bias=False
    wv = weight(ks[1], c, c)
    bv = (0.01 * jax.random.normal(ks[2], (1, c))).astype(jnp.float32)
    wt = weight(ks[3], c, c)
    bt = (0.01 * jax.random.normal(ks[4], (1, c))).astype(jnp.float32)

    gamma = jax.random.uniform(ks[5], (c,), minval=0.8, maxval=1.2)
    beta = 0.1 * jax.random.normal(ks[6], (c,))
    mean = 0.1 * jax.random.normal(ks[7], (c,))
    var = jax.random.uniform(ks[8], (c,), minval=0.5, maxval=1.5)
    scale = gamma / jnp.sqrt(var + 1e-5)
    bias = beta - mean * scale
    return {
        "wqk": wqk, "wv": wv, "bv": bv, "wt": wt, "bt": bt,
        "s": scale.reshape(1, c).astype(jnp.float32),
        "b": bias.reshape(1, c).astype(jnp.float32),
    }


# ----------------------------------------------------------------------------
# Pure-JAX reference (channel-last) for a loose numerical sanity check
# ----------------------------------------------------------------------------
def ref_forward(x_bnc, tp_bnc, p):
    hp = lax.Precision.HIGHEST
    wqk, wv, bv, wt, bt, s, b = (p["wqk"], p["wv"], p["bv"], p["wt"], p["bt"],
                                 p["s"], p["b"])
    xq = jnp.einsum("bnc,cq->bnq", x_bnc, wqk, precision=hp)
    tq = jnp.einsum("bnc,cq->bnq", tp_bnc, wqk, precision=hp)
    e1 = jnp.einsum("biq,bjq->bij", xq, tq, precision=hp)
    e2 = jnp.einsum("biq,bjq->bij", tq, xq, precision=hp)

    def attention(e):
        a = jax.nn.softmax(e, axis=-1)
        return a / (1e-9 + jnp.sum(a, axis=1, keepdims=True))

    a1 = attention(e1)
    a2 = attention(e2)

    def branch(src, base, a):
        v = jnp.einsum("bnc,cd->bnd", src, wv, precision=hp) + bv
        r = jnp.einsum("bij,bic->bjc", a, v, precision=hp)
        t = jnp.einsum("bnc,cd->bnd", src - r, wt, precision=hp) + bt
        t = jnp.maximum(t * s + b, 0.0)
        return base + t

    xn = branch(tp_bnc, x_bnc, a1)
    tpn = branch(xn, tp_bnc, a2)
    return xn, tpn, a1, a2


# ----------------------------------------------------------------------------
if __name__ == "__main__":
    B, C, N = 2, 128, 128                    # channels divisible by 4

    key = jax.random.PRNGKey(0)
    kx, kt, kp = jax.random.split(key, 3)
    x = jax.random.normal(kx, (B, C, N), dtype=jnp.float32)
    tp_x = jax.random.normal(kt, (B, C, N), dtype=jnp.float32)
    params = make_params(kp, C)

    @jax.jit
    def run(x, tp_x, params):
        return amap_forward(x, tp_x, params)

    x_out, tp_out, a1, a2 = run(x, tp_x, params)
    jax.block_until_ready((x_out, tp_out, a1, a2))

    assert x_out.shape == (B, C, N) and tp_out.shape == (B, C, N)
    assert a1.shape == (B, N, N) and a2.shape == (B, N, N)

    # Loose numerical check against a pure-JAX reference.
    x_exp, tp_exp, a1_exp, a2_exp = ref_forward(
        jnp.transpose(x, (0, 2, 1)), jnp.transpose(tp_x, (0, 2, 1)), params)
    ok = (
        bool(jnp.allclose(jnp.transpose(x_out, (0, 2, 1)), x_exp,
                          rtol=5e-2, atol=5e-2))
        and bool(jnp.allclose(jnp.transpose(tp_out, (0, 2, 1)), tp_exp,
                              rtol=5e-2, atol=5e-2))
        and bool(jnp.allclose(a1, a1_exp, rtol=5e-2, atol=5e-2))
        and bool(jnp.allclose(a2, a2_exp, rtol=5e-2, atol=5e-2))
    )
    assert ok, "Pallas output mismatch vs pure-JAX reference"

    print("KERNEL_OK")
</pallas_src>

<mosaic_0001>
module attributes {stable_mosaic.version = 11 : i64} {
  func.func @_amap_kernel(%arg0: i32, %arg1: memref<1x128x128xf32, #tpu.memory_space<vmem>>, %arg2: memref<1x128x128xf32, #tpu.memory_space<vmem>>, %arg3: memref<128x32xf32, #tpu.memory_space<vmem>>, %arg4: memref<128x128xf32, #tpu.memory_space<vmem>>, %arg5: memref<1x128xf32, #tpu.memory_space<vmem>>, %arg6: memref<128x128xf32, #tpu.memory_space<vmem>>, %arg7: memref<1x128xf32, #tpu.memory_space<vmem>>, %arg8: memref<1x128xf32, #tpu.memory_space<vmem>>, %arg9: memref<1x128xf32, #tpu.memory_space<vmem>>, %arg10: memref<1x128x128xf32, #tpu.memory_space<vmem>>, %arg11: memref<1x128x128xf32, #tpu.memory_space<vmem>>, %arg12: memref<1x128x128xf32, #tpu.memory_space<vmem>>, %arg13: memref<1x128x128xf32, #tpu.memory_space<vmem>>) attributes {dimension_semantics = [#tpu.dimension_semantics<parallel>], iteration_bounds = array<i64: 2>, scalar_prefetch = 0 : i64, scratch_operands = 0 : i64, tpu.core_type = #tpu.core_type<tc>, window_params = [{transform_indices = @transform_0, window_bounds = array<i64: 1, 128, 128>}, {transform_indices = @transform_1, window_bounds = array<i64: 1, 128, 128>}, {pipeline_mode = #tpu.pipeline_mode<synchronous>, transform_indices = @transform_2, window_bounds = array<i64: 128, 32>}, {pipeline_mode = #tpu.pipeline_mode<synchronous>, transform_indices = @transform_3, window_bounds = array<i64: 128, 128>}, {pipeline_mode = #tpu.pipeline_mode<synchronous>, transform_indices = @transform_4, window_bounds = array<i64: 1, 128>}, {pipeline_mode = #tpu.pipeline_mode<synchronous>, transform_indices = @transform_5, window_bounds = array<i64: 128, 128>}, {pipeline_mode = #tpu.pipeline_mode<synchronous>, transform_indices = @transform_6, window_bounds = array<i64: 1, 128>}, {pipeline_mode = #tpu.pipeline_mode<synchronous>, transform_indices = @transform_7, window_bounds = array<i64: 1, 128>}, {pipeline_mode = #tpu.pipeline_mode<synchronous>, transform_indices = @transform_8, window_bounds = array<i64: 1, 128>}, {transform_indices = @transform_9, window_bounds = array<i64: 1, 128, 128>}, {transform_indices = @transform_10, window_bounds = array<i64: 1, 128, 128>}, {transform_indices = @transform_11, window_bounds = array<i64: 1, 128, 128>}, {transform_indices = @transform_12, window_bounds = array<i64: 1, 128, 128>}]} {
    %c0 = arith.constant 0 : index
    %c0_0 = arith.constant 0 : index
    %c0_1 = arith.constant 0 : index
    %0 = vector.load %arg1[%c0, %c0_0, %c0_1] : memref<1x128x128xf32, #tpu.memory_space<vmem>>, vector<1x128x128xf32>
    %1 = vector.shape_cast %0 : vector<1x128x128xf32> to vector<128x128xf32>
    %c0_2 = arith.constant 0 : index
    %c0_3 = arith.constant 0 : index
    %c0_4 = arith.constant 0 : index
    %2 = vector.load %arg2[%c0_2, %c0_3, %c0_4] : memref<1x128x128xf32, #tpu.memory_space<vmem>>, vector<1x128x128xf32>
    %3 = vector.shape_cast %2 : vector<1x128x128xf32> to vector<128x128xf32>
    %c0_5 = arith.constant 0 : index
    %c0_6 = arith.constant 0 : index
    %4 = vector.load %arg3[%c0_5, %c0_6] : memref<128x32xf32, #tpu.memory_space<vmem>>, vector<128x32xf32>
    %c0_7 = arith.constant 0 : index
    %c0_8 = arith.constant 0 : index
    %5 = vector.load %arg4[%c0_7, %c0_8] : memref<128x128xf32, #tpu.memory_space<vmem>>, vector<128x128xf32>
    %c0_9 = arith.constant 0 : index
    %c0_10 = arith.constant 0 : index
    %6 = vector.load %arg5[%c0_9, %c0_10] : memref<1x128xf32, #tpu.memory_space<vmem>>, vector<1x128xf32>
    %c0_11 = arith.constant 0 : index
    %c0_12 = arith.constant 0 : index
    %7 = vector.load %arg6[%c0_11, %c0_12] : memref<128x128xf32, #tpu.memory_space<vmem>>, vector<128x128xf32>
    %c0_13 = arith.constant 0 : index
    %c0_14 = arith.constant 0 : index
    %8 = vector.load %arg7[%c0_13, %c0_14] : memref<1x128xf32, #tpu.memory_space<vmem>>, vector<1x128xf32>
    %c0_15 = arith.constant 0 : index
    %c0_16 = arith.constant 0 : index
    %9 = vector.load %arg8[%c0_15, %c0_16] : memref<1x128xf32, #tpu.memory_space<vmem>>, vector<1x128xf32>
    %c0_17 = arith.constant 0 : index
    %c0_18 = arith.constant 0 : index
    %10 = vector.load %arg9[%c0_17, %c0_18] : memref<1x128xf32, #tpu.memory_space<vmem>>, vector<1x128xf32>
    %cst = arith.constant dense<0.000000e+00> : vector<128x32xf32>
    %11 = tpu.matmul %1, %4, %cst {dimension_numbers = #tpu.dot_dimension_numbers<[1], [0], [0], [1], [0, 0, 1, 1], [], []>} : vector<128x128xf32>, vector<128x32xf32>, vector<128x32xf32> -> vector<128x32xf32>
    %cst_19 = arith.constant dense<0.000000e+00> : vector<128x32xf32>
    %12 = tpu.matmul %3, %4, %cst_19 {dimension_numbers = #tpu.dot_dimension_numbers<[1], [0], [0], [1], [0, 0, 1, 1], [], []>} : vector<128x128xf32>, vector<128x32xf32>, vector<128x32xf32> -> vector<128x32xf32>
    %cst_20 = arith.constant dense<0.000000e+00> : vector<128x128xf32>
    %13 = tpu.matmul %11, %12, %cst_20 {dimension_numbers = #tpu.dot_dimension_numbers<[1], [1], [0], [0], [0, 0, 1, 0], [], []>} : vector<128x32xf32>, vector<128x32xf32>, vector<128x128xf32> -> vector<128x128xf32>
    %cst_21 = arith.constant dense<0.000000e+00> : vector<128x128xf32>
    %14 = tpu.matmul %12, %11, %cst_21 {dimension_numbers = #tpu.dot_dimension_numbers<[1], [1], [0], [0], [0, 0, 1, 0], [], []>} : vector<128x32xf32>, vector<128x32xf32>, vector<128x128xf32> -> vector<128x128xf32>
    %cst_22 = arith.constant dense<0xFF800000> : vector<128xf32>
    %15 = vector.multi_reduction <maximumf>, %13, %cst_22 [1] : vector<128x128xf32> to vector<128xf32>
    %16 = vector.shape_cast %15 : vector<128xf32> to vector<128x1xf32>
    %17 = vector.broadcast %16 : vector<128x1xf32> to vector<128x128xf32>
    %18 = arith.subf %13, %17 : vector<128x128xf32>
    %19 = math.exp %18 : vector<128x128xf32>
    %cst_23 = arith.constant dense<0.000000e+00> : vector<128xf32>
    %20 = vector.multi_reduction <add>, %19, %cst_23 [1] : vector<128x128xf32> to vector<128xf32>
    %21 = vector.shape_cast %20 : vector<128xf32> to vector<128x1xf32>
    %22 = vector.broadcast %21 : vector<128x1xf32> to vector<128x128xf32>
    %23 = arith.divf %19, %22 : vector<128x128xf32>
    %cst_24 = arith.constant dense<0.000000e+00> : vector<128xf32>
    %24 = vector.multi_reduction <add>, %23, %cst_24 [0] : vector<128x128xf32> to vector<128xf32>
    %25 = vector.shape_cast %24 : vector<128xf32> to vector<1x128xf32>
    %cst_25 = arith.constant 9.99999971E-10 : f32
    %26 = vector.broadcast %cst_25 : f32 to vector<1x128xf32>
    %27 = arith.addf %26, %25 : vector<1x128xf32>
    %28 = vector.broadcast %27 : vector<1x128xf32> to vector<128x128xf32>
    %29 = arith.divf %23, %28 : vector<128x128xf32>
    %cst_26 = arith.constant dense<0xFF800000> : vector<128xf32>
    %30 = vector.multi_reduction <maximumf>, %14, %cst_26 [1] : vector<128x128xf32> to vector<128xf32>
    %31 = vector.shape_cast %30 : vector<128xf32> to vector<128x1xf32>
    %32 = vector.broadcast %31 : vector<128x1xf32> to vector<128x128xf32>
    %33 = arith.subf %14, %32 : vector<128x128xf32>
    %34 = math.exp %33 : vector<128x128xf32>
    %cst_27 = arith.constant dense<0.000000e+00> : vector<128xf32>
    %35 = vector.multi_reduction <add>, %34, %cst_27 [1] : vector<128x128xf32> to vector<128xf32>
    %36 = vector.shape_cast %35 : vector<128xf32> to vector<128x1xf32>
    %37 = vector.broadcast %36 : vector<128x1xf32> to vector<128x128xf32>
    %38 = arith.divf %34, %37 : vector<128x128xf32>
    %cst_28 = arith.constant dense<0.000000e+00> : vector<128xf32>
    %39 = vector.multi_reduction <add>, %38, %cst_28 [0] : vector<128x128xf32> to vector<128xf32>
    %40 = vector.shape_cast %39 : vector<128xf32> to vector<1x128xf32>
    %cst_29 = arith.constant 9.99999971E-10 : f32
    %41 = vector.broadcast %cst_29 : f32 to vector<1x128xf32>
    %42 = arith.addf %41, %40 : vector<1x128xf32>
    %43 = vector.broadcast %42 : vector<1x128xf32> to vector<128x128xf32>
    %44 = arith.divf %38, %43 : vector<128x128xf32>
    %cst_30 = arith.constant dense<0.000000e+00> : vector<128x128xf32>
    %45 = tpu.matmul %3, %5, %cst_30 {dimension_numbers = #tpu.dot_dimension_numbers<[1], [0], [0], [1], [0, 0, 1, 1], [], []>} : vector<128x128xf32>, vector<128x128xf32>, vector<128x128xf32> -> vector<128x128xf32>
    %46 = vector.broadcast %6 : vector<1x128xf32> to vector<128x128xf32>
    %47 = arith.addf %45, %46 : vector<128x128xf32>
    %cst_31 = arith.constant dense<0.000000e+00> : vector<128x128xf32>
    %48 = tpu.matmul %29, %47, %cst_31 {dimension_numbers = #tpu.dot_dimension_numbers<[0], [0], [1], [1], [0, 1, 1, 1], [], []>} : vector<128x128xf32>, vector<128x128xf32>, vector<128x128xf32> -> vector<128x128xf32>
    %49 = arith.subf %3, %48 : vector<128x128xf32>
    %cst_32 = arith.constant dense<0.000000e+00> : vector<128x128xf32>
    %50 = tpu.matmul %49, %7, %cst_32 {dimension_numbers = #tpu.dot_dimension_numbers<[1], [0], [0], [1], [0, 0, 1, 1], [], []>} : vector<128x128xf32>, vector<128x128xf32>, vector<128x128xf32> -> vector<128x128xf32>
    %51 = vector.broadcast %8 : vector<1x128xf32> to vector<128x128xf32>
    %52 = arith.addf %50, %51 : vector<128x128xf32>
    %53 = vector.broadcast %9 : vector<1x128xf32> to vector<128x128xf32>
    %54 = arith.mulf %52, %53 : vector<128x128xf32>
    %55 = vector.broadcast %10 : vector<1x128xf32> to vector<128x128xf32>
    %56 = arith.addf %54, %55 : vector<128x128xf32>
    %cst_33 = arith.constant 0.000000e+00 : f32
    %57 = vector.broadcast %cst_33 : f32 to vector<128x128xf32>
    %58 = arith.maximumf %56, %57 : vector<128x128xf32>
    %59 = arith.addf %1, %58 : vector<128x128xf32>
    %cst_34 = arith.constant dense<0.000000e+00> : vector<128x128xf32>
    %60 = tpu.matmul %59, %5, %cst_34 {dimension_numbers = #tpu.dot_dimension_numbers<[1], [0], [0], [1], [0, 0, 1, 1], [], []>} : vector<128x128xf32>, vector<128x128xf32>, vector<128x128xf32> -> vector<128x128xf32>
    %61 = vector.broadcast %6 : vector<1x128xf32> to vector<128x128xf32>
    %62 = arith.addf %60, %61 : vector<128x128xf32>
    %cst_35 = arith.constant dense<0.000000e+00> : vector<128x128xf32>
    %63 = tpu.matmul %44, %62, %cst_35 {dimension_numbers = #tpu.dot_dimension_numbers<[0], [0], [1], [1], [0, 1, 1, 1], [], []>} : vector<128x128xf32>, vector<128x128xf32>, vector<128x128xf32> -> vector<128x128xf32>
    %64 = arith.subf %59, %63 : vector<128x128xf32>
    %cst_36 = arith.constant dense<0.000000e+00> : vector<128x128xf32>
    %65 = tpu.matmul %64, %7, %cst_36 {dimension_numbers = #tpu.dot_dimension_numbers<[1], [0], [0], [1], [0, 0, 1, 1], [], []>} : vector<128x128xf32>, vector<128x128xf32>, vector<128x128xf32> -> vector<128x128xf32>
    %66 = vector.broadcast %8 : vector<1x128xf32> to vector<128x128xf32>
    %67 = arith.addf %65, %66 : vector<128x128xf32>
    %68 = vector.broadcast %9 : vector<1x128xf32> to vector<128x128xf32>
    %69 = arith.mulf %67, %68 : vector<128x128xf32>
    %70 = vector.broadcast %10 : vector<1x128xf32> to vector<128x128xf32>
    %71 = arith.addf %69, %70 : vector<128x128xf32>
    %cst_37 = arith.constant 0.000000e+00 : f32
    %72 = vector.broadcast %cst_37 : f32 to vector<128x128xf32>
    %73 = arith.maximumf %71, %72 : vector<128x128xf32>
    %74 = arith.addf %3, %73 : vector<128x128xf32>
    %c0_38 = arith.constant 0 : index
    %c0_39 = arith.constant 0 : index
    %c0_40 = arith.constant 0 : index
    %75 = vector.load %arg10[%c0_38, %c0_39, %c0_40] : memref<1x128x128xf32, #tpu.memory_space<vmem>>, vector<1x128x128xf32>
    %76 = vector.shape_cast %75 : vector<1x128x128xf32> to vector<128x128xf32>
    %77 = vector.shape_cast %59 : vector<128x128xf32> to vector<1x128x128xf32>
    tpu.vector_store %arg10[%c0_38, %c0_39, %c0_40], %77 {strides = array<i32>} : memref<1x128x128xf32, #tpu.memory_space<vmem>>, vector<1x128x128xf32>,
    %c0_41 = arith.constant 0 : index
    %c0_42 = arith.constant 0 : index
    %c0_43 = arith.constant 0 : index
    %78 = vector.load %arg11[%c0_41, %c0_42, %c0_43] : memref<1x128x128xf32, #tpu.memory_space<vmem>>, vector<1x128x128xf32>
    %79 = vector.shape_cast %78 : vector<1x128x128xf32> to vector<128x128xf32>
    %80 = vector.shape_cast %74 : vector<128x128xf32> to vector<1x128x128xf32>
    tpu.vector_store %arg11[%c0_41, %c0_42, %c0_43], %80 {strides = array<i32>} : memref<1x128x128xf32, #tpu.memory_space<vmem>>, vector<1x128x128xf32>,
    %c0_44 = arith.constant 0 : index
    %c0_45 = arith.constant 0 : index
    %c0_46 = arith.constant 0 : index
    %81 = vector.load %arg12[%c0_44, %c0_45, %c0_46] : memref<1x128x128xf32, #tpu.memory_space<vmem>>, vector<1x128x128xf32>
    %82 = vector.shape_cast %81 : vector<1x128x128xf32> to vector<128x128xf32>
    %83 = vector.shape_cast %29 : vector<128x128xf32> to vector<1x128x128xf32>
    tpu.vector_store %arg12[%c0_44, %c0_45, %c0_46], %83 {strides = array<i32>} : memref<1x128x128xf32, #tpu.memory_space<vmem>>, vector<1x128x128xf32>,
    %c0_47 = arith.constant 0 : index
    %c0_48 = arith.constant 0 : index
    %c0_49 = arith.constant 0 : index
    %84 = vector.load %arg13[%c0_47, %c0_48, %c0_49] : memref<1x128x128xf32, #tpu.memory_space<vmem>>, vector<1x128x128xf32>
    %85 = vector.shape_cast %84 : vector<1x128x128xf32> to vector<128x128xf32>
    %86 = vector.shape_cast %44 : vector<128x128xf32> to vector<1x128x128xf32>
    tpu.vector_store %arg13[%c0_47, %c0_48, %c0_49], %86 {strides = array<i32>} : memref<1x128x128xf32, #tpu.memory_space<vmem>>, vector<1x128x128xf32>,
    return
  }
  func.func @transform_0(%arg0: i32) -> (i32, i32, i32) {
    %c0_i32 = arith.constant 0 : i32
    %c0_i32_0 = arith.constant 0 : i32
    %c0_i32_1 = arith.constant 0 : i32
    return %arg0, %c0_i32, %c0_i32_0 : i32, i32, i32
  }
  func.func @transform_1(%arg0: i32) -> (i32, i32, i32) {
    %c0_i32 = arith.constant 0 : i32
    %c0_i32_0 = arith.constant 0 : i32
    %c0_i32_1 = arith.constant 0 : i32
    return %arg0, %c0_i32, %c0_i32_0 : i32, i32, i32
  }
  func.func @transform_2(%arg0: i32) -> (i32, i32) {
    %c0_i32 = arith.constant 0 : i32
    %c0_i32_0 = arith.constant 0 : i32
    %c0_i32_1 = arith.constant 0 : i32
    return %c0_i32, %c0_i32_0 : i32, i32
  }
  func.func @transform_3(%arg0: i32) -> (i32, i32) {
    %c0_i32 = arith.constant 0 : i32
    %c0_i32_0 = arith.constant 0 : i32
    %c0_i32_1 = arith.constant 0 : i32
    return %c0_i32, %c0_i32_0 : i32, i32
  }
  func.func @transform_4(%arg0: i32) -> (i32, i32) {
    %c0_i32 = arith.constant 0 : i32
    %c0_i32_0 = arith.constant 0 : i32
    %c0_i32_1 = arith.constant 0 : i32
    return %c0_i32, %c0_i32_0 : i32, i32
  }
  func.func @transform_5(%arg0: i32) -> (i32, i32) {
    %c0_i32 = arith.constant 0 : i32
    %c0_i32_0 = arith.constant 0 : i32
    %c0_i32_1 = arith.constant 0 : i32
    return %c0_i32, %c0_i32_0 : i32, i32
  }
  func.func @transform_6(%arg0: i32) -> (i32, i32) {
    %c0_i32 = arith.constant 0 : i32
    %c0_i32_0 = arith.constant 0 : i32
    %c0_i32_1 = arith.constant 0 : i32
    return %c0_i32, %c0_i32_0 : i32, i32
  }
  func.func @transform_7(%arg0: i32) -> (i32, i32) {
    %c0_i32 = arith.constant 0 : i32
    %c0_i32_0 = arith.constant 0 : i32
    %c0_i32_1 = arith.constant 0 : i32
    return %c0_i32, %c0_i32_0 : i32, i32
  }
  func.func @transform_8(%arg0: i32) -> (i32, i32) {
    %c0_i32 = arith.constant 0 : i32
    %c0_i32_0 = arith.constant 0 : i32
    %c0_i32_1 = arith.constant 0 : i32
    return %c0_i32, %c0_i32_0 : i32, i32
  }
  func.func @transform_9(%arg0: i32) -> (i32, i32, i32) {
    %c0_i32 = arith.constant 0 : i32
    %c0_i32_0 = arith.constant 0 : i32
    %c0_i32_1 = arith.constant 0 : i32
    return %arg0, %c0_i32, %c0_i32_0 : i32, i32, i32
  }
  func.func @transform_10(%arg0: i32) -> (i32, i32, i32) {
    %c0_i32 = arith.constant 0 : i32
    %c0_i32_0 = arith.constant 0 : i32
    %c0_i32_1 = arith.constant 0 : i32
    return %arg0, %c0_i32, %c0_i32_0 : i32, i32, i32
  }
  func.func @transform_11(%arg0: i32) -> (i32, i32, i32) {
    %c0_i32 = arith.constant 0 : i32
    %c0_i32_0 = arith.constant 0 : i32
    %c0_i32_1 = arith.constant 0 : i32
    return %arg0, %c0_i32, %c0_i32_0 : i32, i32, i32
  }
  func.func @transform_12(%arg0: i32) -> (i32, i32, i32) {
    %c0_i32 = arith.constant 0 : i32
    %c0_i32_0 = arith.constant 0 : i32
    %c0_i32_1 = arith.constant 0 : i32
    return %arg0, %c0_i32, %c0_i32_0 : i32, i32, i32
  }
}

</mosaic_0001>

<bundles_post_ra>
// kernel: run.1
= control target key start
LH: loop header
LB: loop body
LE: loop exit
PB: predicated region body
PF: predicated region fallthrough
CT: control target
= control target key end

     0   :  { %s6095_s0 = inlined_call_operand.vmem [shape: f32[2,128,128], index: 0, kind: input, shape index: {}]   ;;  %s6096_s1 = inlined_call_operand.vmem [shape: f32[2,128,128], index: 1, kind: input, shape index: {}]   ;;  %s6097_s2 = inlined_call_operand.vmem [shape: f32[128,32], index: 2, kind: input, shape index: {}]   ;;  %s6098_s3 = inlined_call_operand.vmem [shape: f32[128,128], index: 3, kind: input, shape index: {}]   ;;  %s6099_s4 = inlined_call_operand.vmem [shape: f32[1,128], index: 4, kind: input, shape index: {}]   ;;  %s6100_s5 = inlined_call_operand.vmem [shape: f32[128,128], index: 5, kind: input, shape index: {}]   ;;  %s6101_s6 = inlined_call_operand.vmem [shape: f32[1,128], index: 6, kind: input, shape index: {}]   ;;  %s6102_s7 = inlined_call_operand.vmem [shape: f32[1,128], index: 7, kind: input, shape index: {}]   ;;  %s6103_s8 = inlined_call_operand.vmem [shape: f32[1,128], index: 8, kind: input, shape index: {}]   ;;  %s6104_s9 = inlined_call_operand.vmem [shape: f32[2,128,128], index: 9, kind: output, shape index: {0}]   ;;  %s6105_s10 = inlined_call_operand.vmem [shape: f32[2,128,128], index: 10, kind: output, shape index: {1}]   ;;  %s6106_s11 = inlined_call_operand.hbm [shape: f32[2,128,128], index: 11, kind: output, shape index: {2}]   ;;  %s6107_s12 = inlined_call_operand.hbm [shape: f32[2,128,128], index: 12, kind: output, shape index: {3}]  }
   0x1   :  { %6111 = sst [smem:[#allocation10_spill]] %s6095_s0 }
   0x2   :  { %6112 = sst [smem:[#allocation11_spill]] %s6096_s1 }
   0x3   :  { %6113 = sst [smem:[#allocation12_spill]] %s6097_s2 }
   0x4   :  { %6114 = sst [smem:[#allocation13_spill]] %s6098_s3 }
   0x5   :  { %6115 = sst [smem:[#allocation14_spill]] %s6099_s4 }
   0x6   :  { %18 = vsyncpa [#allocation3], 0 }
   0x7   :  { %20 = vsyncpa [#allocation3 + $0x1], 0 }
   0x8   :  { %21 = vsyncpa [#allocation5], 0 }
   0x9   :  { %23 = vsyncpa [#allocation5 + $0x1], 0  ;;  %s4687_s21 = smov 0   ;;  %s4689_s22 = smov 0  }
   0xa   :  { %s4691_s23 = smov 0   ;;  %s4693_s24 = smov 0  }
   0xb LB: > { %6116 = sst [smem:[#allocation8_spill]] %s4612_s23  ;;  %s4708_s25 = sadd.s32 4294967295, %s4616_s24   ;;  %s4616_s24 = sphi %s4693_s24, %s6134_s24   ;;  %s4612_s23 = sphi %s4691_s23, %s6131_s23   ;;  %s4608_s22 = sphi %s4689_s22, %s6133_s22   ;;  %s4604_s21 = sphi %s4687_s21, %s6132_s21  }
   0xc   : > { %s2983_s26 = sadd.s32 4294967294, %s4616_s24   ;;  %s4712_s27 = sadd.s32 1, %s4616_s24  }
   0xd   : > { %s287_s28 = sadd.s32 1, %s4612_s23  ;;  %s284_s29 = ssub.s32 %s4616_s24, %s4712_s27 }
   0xe   : > { %p297_p0 = scmp.ne.s32.totalorder %s4612_s23, %s4608_s22  ;;  %p285_p1 = scmp.eq.s32.totalorder %s284_s29, 0 }
   0xf   : > { %p298_p2 = scmp.eq.s32.totalorder %s4708_s25, 1  ;;  %p303_p3 = scmp.ne.s32.totalorder %s4608_s22, %s4604_s21 }
  0x10   : > { %p304_p4 = scmp.eq.s32.totalorder %s2983_s26, 1  ;;  %p2986_p7 = scmp.ge.s32.totalorder %s4616_s24, 1 }
  0x11   : > { %s4723_s30 = scalar_select %p285_p1, %s4612_s23, %s287_s28  }
  0x12   : > { %p4725_p5 = por %p298_p2, %p297_p0  ;;  %p4729_p6 = por %p304_p4, %p303_p3 }
  0x13   : > { %6117 = sst [smem:[#allocation9_spill]] %s4723_s30  ;;  %p385_p8 = scmp.lt.s32.totalorder %s4616_s24, 3 }
  0x15   : > { %p386_p9 = pnand %p2986_p7, %p385_p8 }
  0x16   : > { %s6120_s2 = sld [smem:[#allocation12_spill]] (!%p386_p9)  ;;  %p447_p10 = scmp.lt.s32.totalorder (!%p386_p9), %s4708_s25, 1  ;;  %vm841_vm0 = vcmask (!%p386_p9), 261120  }
  0x17   : > { %389 = sbr.rel (%p386_p9) target bundleno = 2246 (0x8c6), region = 56  ;;  %s6121_s0 = sld [smem:[#allocation10_spill]] (!%p386_p9)  ;;  %vm4885_vm1 = vmpackc.low (!%p386_p9), %vm841_vm0, %vm841_vm0 }
  0x18   : > { %s6122_s1 = sld [smem:[#allocation11_spill]] (!%p386_p9)  ;;  %s6125_s3 = sld [smem:[#allocation13_spill]] (!%p386_p9) }
  0x19   : > { %s6126_s4 = sld [smem:[#allocation14_spill]] (!%p386_p9)  ;;  %s5391_s28 = sand.u32 (!%p386_p9), 1, %s4608_s22  }
  0x1a   : > { %s6109_s30 = sshll.u32 (!%p386_p9), %s5391_s28, 7  ;;  %s4618_s19 = smov (!%p386_p9), [#allocation2]  }
  0x1b   : > { %s5418_s29 = scalar_lea.vmem (!%p386_p9), [#allocation2], %s6109_s30  ;;  %s4526_s30 = sshll.u32 (!%p386_p9), %s4618_s19, 4  ;;  %s4527_s30 = int_to_ptr.vmem [resolvable:$false] %s4526_s30 }
  0x1c   : > { %v499_v0 = vld [vmem:[%s6120_s2] sm:$0xff] (!%p386_p9)  ;;  %v500_v1 = vld [vmem:[%s6120_s2 + $0x8] sm:$0xff] (!%p386_p9)  ;;  %v501_v2 = vld [vmem:[%s6120_s2 + $0x10] sm:$0xff] (!%p386_p9)  ;;  %s2811_s20 = sshll.u32 (!%p386_p9), %s5418_s29, 4  ;;  %s5926_s20 = int_to_ptr.vmem [resolvable:$true] %s2811_s20 }
  0x1d   : > { %v3959_v3 = vpack.c.bf16 (!%p386_p9), %v500_v1, %v499_v0  ;;  %v502_v4 = vld [vmem:[%s6120_s2 + $0x18] sm:$0xff] (!%p386_p9)  ;;  %v503_v6 = vld [vmem:[%s6120_s2 + $0x20] sm:$0xff] (!%p386_p9)  ;;  %v504_v7 = vld [vmem:[%s6120_s2 + $0x28] sm:$0xff] (!%p386_p9)  ;;  %p4529_p0 = scmp.lt.s32.totalorder (!%p386_p9), %s5926_s20, %s4527_s30 }
  0x1e   : > { %v3963_v5 = vpack.c.bf16 %v502_v4, %v501_v2  ;;  %s448_s17 = scalar_select %p447_p10, %s4708_s25, 1  ;;  %v3967_v8 = vpack.c.bf16 %v504_v7, %v503_v6  ;;  %v505_v9 = vld [vmem:[%s6120_s2 + $0x30] sm:$0xff]  ;;  %v506_v10 = vld [vmem:[%s6120_s2 + $0x38] sm:$0xff]  ;;  %v507_v14 = vld [vmem:[%s6120_s2 + $0x40] sm:$0xff] }
  0x1f   : > { %3960 = vmatprep.subr.bf16.mxu0 %v3959_v3  ;;  %3992 = vmatprep.subr.bf16.mxu1 %v3959_v3  ;;  %v3971_v13 = vpack.c.bf16 %v506_v10, %v505_v9  ;;  %v508_v15 = vld [vmem:[%s6120_s2 + $0x48] sm:$0xff]  ;;  %v509_v17 = vld [vmem:[%s6120_s2 + $0x50] sm:$0xff]  ;;  %v510_v18 = vld [vmem:[%s6120_s2 + $0x58] sm:$0xff] }
  0x20   : > { %3962 = vmatpush3.bf16.msra.mxu0 %v3959_v3  ;;  %3994 = vmatpush3.bf16.msra.mxu1 %v3959_v3  ;;  %s4755_s18 = sshll.u32 %s448_s17, 7  ;;  %v3975_v16 = vpack.c.bf16 %v508_v15, %v507_v14  ;;  %v3979_v19 = vpack.c.bf16 %v510_v18, %v509_v17  ;;  %v511_v20 = vld [vmem:[%s6120_s2 + $0x60] sm:$0xff]  ;;  %v512_v21 = vld [vmem:[%s6120_s2 + $0x68] sm:$0xff]  ;;  %v513_v23 = vld [vmem:[%s6120_s2 + $0x70] sm:$0xff] }
  0x21   : > { %3964 = vmatprep.subr.bf16.mxu0 %v3963_v5  ;;  %3996 = vmatprep.subr.bf16.mxu1 %v3963_v5  ;;  %s4761_s26 = scalar_lea.vmem %s6121_s0, %s4755_s18  ;;  %s4774_s23 = scalar_lea.vmem %s6122_s1, %s4755_s18  ;;  %v3983_v22 = vpack.c.bf16 %v512_v21, %v511_v20  ;;  %v514_v24 = vld [vmem:[%s6120_s2 + $0x78] sm:$0xff] }
  0x22   : > { %v467_v11 = vld [vmem:[%s4761_s26] sm:$0xff]  ;;  %v3987_v25 = vpack.c.bf16 %v514_v24, %v513_v23  ;;  %v468_v26 = vld [vmem:[%s4761_s26 + $0x8] sm:$0xff]  ;;  %v4809_v28 = vld [vmem:[%s4774_s23 + $0x10] sm:$0xff]  ;;  %s6127_s0 = sshll.u32 %s5391_s28, 7  ;;  %s5743_s17 = scalar_lea.vmem %s6104_s9, %s4755_s18 }
  0x23   : > { %3431 = vmatprep.mubr.f32.mxu0 %v467_v11  ;;  %v4777_v12 = vld [vmem:[%s4774_s23] sm:$0xff]  ;;  %v4806_v27 = vld [vmem:[%s4774_s23 + $0x8] sm:$0xff]  ;;  %v469_v29 = vld [vmem:[%s4761_s26 + $0x10] sm:$0xff]  ;;  %s5636_s1 = scalar_lea.vmem [#allocation4], %s6127_s0 }
  0x24   : > { %3966 = vmatpush3.bf16.msra.mxu0 %v3963_v5  ;;  %3998 = vmatpush3.bf16.msra.mxu1 %v3963_v5  ;;  %v4815_v30 = vld [vmem:[%s4774_s23 + $0x18] sm:$0xff]  ;;  %v4819_v32 = vld [vmem:[%s4774_s23 + $0x20] sm:$0xff]  ;;  %v4825_v34 = vld [vmem:[%s4774_s23 + $0x28] sm:$0xff] }
  0x25   : > { %3968 = vmatprep.subr.bf16.mxu0 %v3967_v8  ;;  %4000 = vmatprep.subr.bf16.mxu1 %v3967_v8  ;;  %v470_v31 = vld [vmem:[%s4761_s26 + $0x18] sm:$0xff]  ;;  %v471_v33 = vld [vmem:[%s4761_s26 + $0x20] sm:$0xff]  ;;  %v472_v35 = vld [vmem:[%s4761_s26 + $0x28] sm:$0xff] }
  0x26   : > { %3487 = vmatprep.mubr.f32.mxu1 %v4777_v12  ;;  %v4829_v36 = vld [vmem:[%s4774_s23 + $0x30] sm:$0xff]  ;;  %v4835_v38 = vld [vmem:[%s4774_s23 + $0x38] sm:$0xff]  ;;  %v4839_v40 = vld [vmem:[%s4774_s23 + $0x40] sm:$0xff] }
  0x27   : > { %v473_v37 = vld [vmem:[%s4761_s26 + $0x30] sm:$0xff]  ;;  %v474_v39 = vld [vmem:[%s4761_s26 + $0x38] sm:$0xff]  ;;  %v475_v41 = vld [vmem:[%s4761_s26 + $0x40] sm:$0xff] }
  0x28   : > { %3970 = vmatpush3.bf16.msra.mxu0 %v3967_v8  ;;  %4002 = vmatpush3.bf16.msra.mxu1 %v3967_v8  ;;  %v4845_v42 = vld [vmem:[%s4774_s23 + $0x48] sm:$0xff]  ;;  %v4849_v44 = vld [vmem:[%s4774_s23 + $0x50] sm:$0xff]  ;;  %v4855_v46 = vld [vmem:[%s4774_s23 + $0x58] sm:$0xff] }
  0x29   : > { %3972 = vmatprep.subr.bf16.mxu0 %v3971_v13  ;;  %4004 = vmatprep.subr.bf16.mxu1 %v3971_v13  ;;  %v476_v43 = vld [vmem:[%s4761_s26 + $0x48] sm:$0xff]  ;;  %v477_v45 = vld [vmem:[%s4761_s26 + $0x50] sm:$0xff]  ;;  %v478_v47 = vld [vmem:[%s4761_s26 + $0x58] sm:$0xff] }
  0x2a   : > { %v4859_v48 = vld [vmem:[%s4774_s23 + $0x60] sm:$0xff]  ;;  %v4865_v50 = vld [vmem:[%s4774_s23 + $0x68] sm:$0xff]  ;;  %v4869_v52 = vld [vmem:[%s4774_s23 + $0x70] sm:$0xff] }
  0x2b   : > { %v479_v49 = vld [vmem:[%s4761_s26 + $0x60] sm:$0xff]  ;;  %v480_v51 = vld [vmem:[%s4761_s26 + $0x68] sm:$0xff]  ;;  %v481_v53 = vld [vmem:[%s4761_s26 + $0x70] sm:$0xff] }
  0x2c   : > { %3974 = vmatpush3.bf16.msra.mxu0 %v3971_v13  ;;  %4006 = vmatpush3.bf16.msra.mxu1 %v3971_v13  ;;  %v4875_v54 = vld [vmem:[%s4774_s23 + $0x78] sm:$0xff] }
  0x2d   : > { %3976 = vmatprep.subr.bf16.mxu0 %v3975_v16  ;;  %4008 = vmatprep.subr.bf16.mxu1 %v3975_v16  ;;  %v482_v55 = vld [vmem:[%s4761_s26 + $0x78] sm:$0xff] }
  0x30   : > { %3978 = vmatpush3.bf16.msra.mxu0 %v3975_v16  ;;  %4010 = vmatpush3.bf16.msra.mxu1 %v3975_v16 }
  0x31   : > { %3980 = vmatprep.subr.bf16.mxu0 %v3979_v19  ;;  %4012 = vmatprep.subr.bf16.mxu1 %v3979_v19 }
  0x34   : > { %3982 = vmatpush3.bf16.msra.mxu0 %v3979_v19  ;;  %4014 = vmatpush3.bf16.msra.mxu1 %v3979_v19 }
  0x35   : > { %3984 = vmatprep.subr.bf16.mxu0 %v3983_v22  ;;  %4016 = vmatprep.subr.bf16.mxu1 %v3983_v22 }
  0x38   : > { %3986 = vmatpush3.bf16.msra.mxu0 %v3983_v22  ;;  %4018 = vmatpush3.bf16.msra.mxu1 %v3983_v22 }
  0x39   : > { %3988 = vmatprep.subr.bf16.mxu0 %v3987_v25  ;;  %4020 = vmatprep.subr.bf16.mxu1 %v3987_v25 }
  0x3c   : > { %3990 = vmatpush3.bf16.msra.mxu0 %v3987_v25  ;;  %4022 = vmatpush3.bf16.msra.mxu1 %v3987_v25 }
  0x3f   : > { %3432 = vmatmul.mubr.f32.vlgmr.msra.gmra.mrb[0].mxu0 %v468_v26  ;;  %3488 = vmatmul.mubr.f32.vlgmr.msra.gmra.mrb[0].mxu1 %v4806_v27 }
  0x40   : > { %3490 = vmatprep.mubr.f32.mxu1 %v4809_v28  ;;  %3434 = vmatprep.mubr.f32.mxu0 %v469_v29 }
  0x43   : > { %3491 = vmatmul.mubr.f32.gmra.mrb[2].mxu1 %v4815_v30  ;;  %3435 = vmatmul.mubr.f32.gmra.mrb[2].mxu0 %v470_v31 }
  0x44   : > { %3493 = vmatprep.mubr.f32.mxu1 %v4819_v32  ;;  %3437 = vmatprep.mubr.f32.mxu0 %v471_v33 }
  0x47   : > { %3494 = vmatmul.mubr.f32.gmra.mrb[4].mxu1 %v4825_v34  ;;  %3438 = vmatmul.mubr.f32.gmra.mrb[4].mxu0 %v472_v35 }
  0x48   : > { %3496 = vmatprep.mubr.f32.mxu1 %v4829_v36  ;;  %3440 = vmatprep.mubr.f32.mxu0 %v473_v37 }
  0x4b   : > { %3497 = vmatmul.mubr.f32.gmra.mrb[6].mxu1 %v4835_v38  ;;  %3441 = vmatmul.mubr.f32.gmra.mrb[6].mxu0 %v474_v39 }
  0x4c   : > { %3499 = vmatprep.mubr.f32.mxu1 %v4839_v40  ;;  %3443 = vmatprep.mubr.f32.mxu0 %v475_v41 }
  0x4f   : > { %3500 = vmatmul.mubr.f32.gmra.mrb[8].mxu1 %v4845_v42  ;;  %3444 = vmatmul.mubr.f32.gmra.mrb[8].mxu0 %v476_v43 }
  0x50   : > { %3502 = vmatprep.mubr.f32.mxu1 %v4849_v44  ;;  %3446 = vmatprep.mubr.f32.mxu0 %v477_v45 }
  0x53   : > { %3503 = vmatmul.mubr.f32.gmra.mrb[10].mxu1 %v4855_v46  ;;  %3447 = vmatmul.mubr.f32.gmra.mrb[10].mxu0 %v478_v47 }
  0x54   : > { %3505 = vmatprep.mubr.f32.mxu1 %v4859_v48  ;;  %3449 = vmatprep.mubr.f32.mxu0 %v479_v49 }
  0x57   : > { %3506 = vmatmul.mubr.f32.gmra.mrb[12].mxu1 %v4865_v50  ;;  %3450 = vmatmul.mubr.f32.gmra.mrb[12].mxu0 %v480_v51 }
  0x58   : > { %3508 = vmatprep.mubr.f32.mxu1 %v4869_v52  ;;  %3452 = vmatprep.mubr.f32.mxu0 %v481_v53 }
  0x5b   : > { %3509 = vmatmul.mubr.f32.gmra.mrb[14].mxu1 %v4875_v54  ;;  %3453 = vmatmul.mubr.f32.gmra.mrb[14].mxu0 %v482_v55 }
 0x112   : > { %v4879_v56 = vpop.f32.mrb[0].mxu0  ;;  %v4881_v57 = vpop.f32.mrb[0].mxu1 }
 0x113   : > { %v617_v58 = vpop.f32.mrb[1].mxu0  ;;  %v762_v59 = vpop.f32.mrb[1].mxu1 }
 0x114   : > { %v4071_v61 = vpack.c.bf16 %v4879_v56, %v617_v58  ;;  %v4023_v62 = vpack.c.bf16 %v4881_v57, %v762_v59  ;;  %3599 = vmatprep.mubr.msk.f32.mxu1 %vm841_vm0, %v762_v59  ;;  %3543 = vmatprep.mubr.msk.f32.mxu0 %vm841_vm0, %v617_v58 }
 0x116   : > { %4025 = vmatprep.subr.msk.bf16.mxu0 %vm4885_vm1, %v4023_v62  ;;  %4073 = vmatprep.subr.msk.bf16.mxu1 %vm4885_vm1, %v4071_v61  ;;  %v4897_v63 = vpop.f32.mrb[2].mxu1  ;;  %v4899_v0 = vpop.f32.mrb[2].mxu0 }
 0x117   : > { %4028 = vmatpush3.bf16.xpose.msk.msra.mxu0 %vm4885_vm1, %v4023_v62  ;;  %4076 = vmatpush3.bf16.xpose.msk.msra.mxu1 %vm4885_vm1, %v4071_v61  ;;  %v4905_v1 = vpop.f32.mrb[3].mxu1  ;;  %v4907_v2 = vpop.f32.mrb[3].mxu0 }
 0x118   : > { %v4029_v3 = vpack.c.bf16 %v4897_v63, %v4905_v1  ;;  %v4077_v4 = vpack.c.bf16 %v4899_v0, %v4907_v2 }
 0x11a   : > { %4031 = vmatprep.subr.msk.bf16.mxu0 %vm4885_vm1, %v4029_v3  ;;  %4079 = vmatprep.subr.msk.bf16.mxu1 %vm4885_vm1, %v4077_v4  ;;  %v4917_v5 = vpop.f32.mrb[4].mxu1  ;;  %v4919_v6 = vpop.f32.mrb[4].mxu0 }
 0x11b   : > { %v4921_v7 = vpop.f32.mrb[5].mxu1  ;;  %v4923_v8 = vpop.f32.mrb[5].mxu0 }
 0x11c   : > { %v4035_v9 = vpack.c.bf16 %v4917_v5, %v4921_v7  ;;  %v4083_v10 = vpack.c.bf16 %v4919_v6, %v4923_v8 }
 0x11e   : > { %v4929_v11 = vpop.f32.mrb[6].mxu1  ;;  %v4931_v13 = vpop.f32.mrb[6].mxu0 }
 0x11f   : > { %4034 = vmatpush3.bf16.xpose.msk.msra.mxu0 %vm4885_vm1, %v4029_v3  ;;  %4082 = vmatpush3.bf16.xpose.msk.msra.mxu1 %vm4885_vm1, %v4077_v4  ;;  %v792_v14 = vpop.f32.mrb[7].mxu1  ;;  %v647_v15 = vpop.f32.mrb[7].mxu0 }
 0x120   : > { %4037 = vmatprep.subr.msk.bf16.mxu0 %vm4885_vm1, %v4035_v9  ;;  %4085 = vmatprep.subr.msk.bf16.mxu1 %vm4885_vm1, %v4083_v10  ;;  %v4041_v16 = vpack.c.bf16 %v4929_v11, %v792_v14  ;;  %v4089_v17 = vpack.c.bf16 %v4931_v13, %v647_v15 }
 0x122   : > { %v4943_v18 = vpop.f32.mrb[8].mxu1  ;;  %v3445_v19 = vpop.f32.mrb[8].mxu0 }
 0x123   : > { %v802_v20 = vpop.f32.mrb[9].mxu1  ;;  %v657_v21 = vpop.f32.mrb[9].mxu0 }
 0x124   : > { %v4047_v22 = vpack.c.bf16 %v4943_v18, %v802_v20  ;;  %v4095_v23 = vpack.c.bf16 %v3445_v19, %v657_v21 }
 0x126   : > { %v3504_v24 = vpop.f32.mrb[10].mxu1  ;;  %v3448_v25 = vpop.f32.mrb[10].mxu0 }
 0x127   : > { %4040 = vmatpush3.bf16.xpose.msk.msra.mxu0 %vm4885_vm1, %v4035_v9  ;;  %4088 = vmatpush3.bf16.xpose.msk.msra.mxu1 %vm4885_vm1, %v4083_v10  ;;  %v812_v26 = vpop.f32.mrb[11].mxu1  ;;  %v667_v29 = vpop.f32.mrb[11].mxu0 }
 0x128   : > { %4043 = vmatprep.subr.msk.bf16.mxu0 %vm4885_vm1, %v4041_v16  ;;  %4091 = vmatprep.subr.msk.bf16.mxu1 %vm4885_vm1, %v4089_v17  ;;  %v4053_v31 = vpack.c.bf16 %v3504_v24, %v812_v26  ;;  %v4101_v33 = vpack.c.bf16 %v3448_v25, %v667_v29 }
 0x12a   : > { %v3507_v35 = vpop.f32.mrb[12].mxu1  ;;  %v3451_v37 = vpop.f32.mrb[12].mxu0 }
 0x12b   : > { %v822_v39 = vpop.f32.mrb[13].mxu1  ;;  %v677_v41 = vpop.f32.mrb[13].mxu0 }
 0x12c   : > { %v4059_v43 = vpack.c.bf16 %v3507_v35, %v822_v39  ;;  %v4107_v45 = vpack.c.bf16 %v3451_v37, %v677_v41 }
 0x12e   : > { %v3510_v47 = vpop.f32.mrb[14].mxu1  ;;  %v3454_v49 = vpop.f32.mrb[14].mxu0 }
 0x12f   : > { %4046 = vmatpush3.bf16.xpose.msk.msra.mxu0 %vm4885_vm1, %v4041_v16  ;;  %4094 = vmatpush3.bf16.xpose.msk.msra.mxu1 %vm4885_vm1, %v4089_v17  ;;  %v832_v51 = vpop.f32.mrb[15].mxu1  ;;  %v687_v53 = vpop.f32.mrb[15].mxu0 }
 0x130   : > { %4049 = vmatprep.subr.msk.bf16.mxu0 %vm4885_vm1, %v4047_v22  ;;  %4097 = vmatprep.subr.msk.bf16.mxu1 %vm4885_vm1, %v4095_v23  ;;  %v4065_v55 = vpack.c.bf16 %v3510_v47, %v832_v51  ;;  %v4113_v58 = vpack.c.bf16 %v3454_v49, %v687_v53 }
 0x137   : > { %4052 = vmatpush3.bf16.xpose.msk.msra.mxu0 %vm4885_vm1, %v4047_v22  ;;  %4100 = vmatpush3.bf16.xpose.msk.msra.mxu1 %vm4885_vm1, %v4095_v23 }
 0x138   : > { %4055 = vmatprep.subr.msk.bf16.mxu0 %vm4885_vm1, %v4053_v31  ;;  %4103 = vmatprep.subr.msk.bf16.mxu1 %vm4885_vm1, %v4101_v33 }
 0x13f   : > { %4058 = vmatpush3.bf16.xpose.msk.msra.mxu0 %vm4885_vm1, %v4053_v31  ;;  %4106 = vmatpush3.bf16.xpose.msk.msra.mxu1 %vm4885_vm1, %v4101_v33  ;;  %v517_v31 = vld [vmem:[%s6125_s3 + $0x10] sm:$0xff]  ;;  %v518_v33 = vld [vmem:[%s6125_s3 + $0x18] sm:$0xff] }
 0x140   : > { %4061 = vmatprep.subr.msk.bf16.mxu0 %vm4885_vm1, %v4059_v43  ;;  %4109 = vmatprep.subr.msk.bf16.mxu1 %vm4885_vm1, %v4107_v45 }
 0x147   : > { %4064 = vmatpush3.bf16.xpose.msk.msra.mxu0 %vm4885_vm1, %v4059_v43  ;;  %4112 = vmatpush3.bf16.xpose.msk.msra.mxu1 %vm4885_vm1, %v4107_v45  ;;  %v521_v43 = vld [vmem:[%s6125_s3 + $0x30] sm:$0xff]  ;;  %v522_v45 = vld [vmem:[%s6125_s3 + $0x38] sm:$0xff] }
 0x148   : > { %4067 = vmatprep.subr.msk.bf16.mxu0 %vm4885_vm1, %v4065_v55  ;;  %4115 = vmatprep.subr.msk.bf16.mxu1 %vm4885_vm1, %v4113_v58 }
 0x14f   : > { %4070 = vmatpush3.bf16.xpose.msk.msra.mxu0 %vm4885_vm1, %v4065_v55  ;;  %4118 = vmatpush3.bf16.xpose.msk.msra.mxu1 %vm4885_vm1, %v4113_v58  ;;  %v525_v55 = vld [vmem:[%s6125_s3 + $0x50] sm:$0xff]  ;;  %v526_v58 = vld [vmem:[%s6125_s3 + $0x58] sm:$0xff] }
 0x156   : > { %3544 = vmatmul.mubr.msk.f32.vlgmr.msra.gmra.mrb[16].mxu0 %vm841_vm0, %v4879_v56  ;;  %3600 = vmatmul.mubr.msk.f32.vlgmr.msra.gmra.mrb[16].mxu1 %vm841_vm0, %v4881_v57 }
 0x157   : > { %3602 = vmatprep.mubr.msk.f32.mxu1 %vm841_vm0, %v4905_v1  ;;  %3546 = vmatprep.mubr.msk.f32.mxu0 %vm841_vm0, %v4907_v2 }
 0x15a   : > { %3547 = vmatmul.mubr.msk.f32.gmra.mrb[18].mxu0 %vm841_vm0, %v4899_v0  ;;  %3603 = vmatmul.mubr.msk.f32.gmra.mrb[18].mxu1 %vm841_vm0, %v4897_v63 }
 0x15b   : > { %3605 = vmatprep.mubr.msk.f32.mxu1 %vm841_vm0, %v4921_v7  ;;  %3549 = vmatprep.mubr.msk.f32.mxu0 %vm841_vm0, %v4923_v8 }
 0x15e   : > { %3550 = vmatmul.mubr.msk.f32.gmra.mrb[20].mxu0 %vm841_vm0, %v4919_v6  ;;  %3606 = vmatmul.mubr.msk.f32.gmra.mrb[20].mxu1 %vm841_vm0, %v4917_v5 }
 0x15f   : > { %3608 = vmatprep.mubr.msk.f32.mxu1 %vm841_vm0, %v792_v14  ;;  %3552 = vmatprep.mubr.msk.f32.mxu0 %vm841_vm0, %v647_v15 }
 0x162   : > { %3553 = vmatmul.mubr.msk.f32.gmra.mrb[22].mxu0 %vm841_vm0, %v4931_v13  ;;  %3609 = vmatmul.mubr.msk.f32.gmra.mrb[22].mxu1 %vm841_vm0, %v4929_v11 }
 0x163   : > { %3611 = vmatprep.mubr.msk.f32.mxu1 %vm841_vm0, %v802_v20  ;;  %3555 = vmatprep.mubr.msk.f32.mxu0 %vm841_vm0, %v657_v21 }
 0x166   : > { %3556 = vmatmul.mubr.msk.f32.gmra.mrb[24].mxu0 %vm841_vm0, %v3445_v19  ;;  %3612 = vmatmul.mubr.msk.f32.gmra.mrb[24].mxu1 %vm841_vm0, %v4943_v18 }
 0x167   : > { %3614 = vmatprep.mubr.msk.f32.mxu1 %vm841_vm0, %v812_v26  ;;  %3558 = vmatprep.mubr.msk.f32.mxu0 %vm841_vm0, %v667_v29  ;;  %v516_v26 = vld [vmem:[%s6125_s3 + $0x8] sm:$0xff] }
 0x16a   : > { %3559 = vmatmul.mubr.msk.f32.gmra.mrb[26].mxu0 %vm841_vm0, %v3448_v25  ;;  %3615 = vmatmul.mubr.msk.f32.gmra.mrb[26].mxu1 %vm841_vm0, %v3504_v24  ;;  %v515_v25 = vld [vmem:[%s6125_s3] sm:$0xff] }
 0x16b   : > { %3617 = vmatprep.mubr.msk.f32.mxu1 %vm841_vm0, %v822_v39  ;;  %3561 = vmatprep.mubr.msk.f32.mxu0 %vm841_vm0, %v677_v41  ;;  %v5120_v29 = vpack.c.bf16 %v516_v26, %v515_v25  ;;  %v520_v39 = vld [vmem:[%s6125_s3 + $0x28] sm:$0xff]  ;;  %v5170_v25 = vpack.c.bf16 %v526_v58, %v525_v55  ;;  %v527_v26 = vld [vmem:[%s6125_s3 + $0x60] sm:$0xff] }
 0x16d   : > { %4120 = vmatprep.subr.bf16.mxu0 %v5120_v29 }
 0x16e   : > { %3562 = vmatmul.mubr.msk.f32.gmra.mrb[28].mxu0 %vm841_vm0, %v3451_v37  ;;  %3618 = vmatmul.mubr.msk.f32.gmra.mrb[28].mxu1 %vm841_vm0, %v3507_v35  ;;  %v5130_v35 = vpack.c.bf16 %v518_v33, %v517_v31  ;;  %v519_v37 = vld [vmem:[%s6125_s3 + $0x20] sm:$0xff]  ;;  %v528_v31 = vld [vmem:[%s6125_s3 + $0x68] sm:$0xff] }
 0x16f   : > { %3620 = vmatprep.mubr.msk.f32.mxu1 %vm841_vm0, %v832_v51  ;;  %3564 = vmatprep.mubr.msk.f32.mxu0 %vm841_vm0, %v687_v53  ;;  %v5140_v41 = vpack.c.bf16 %v520_v39, %v519_v37  ;;  %v524_v51 = vld [vmem:[%s6125_s3 + $0x48] sm:$0xff]  ;;  %v5180_v33 = vpack.c.bf16 %v528_v31, %v527_v26  ;;  %v529_v37 = vld [vmem:[%s6125_s3 + $0x70] sm:$0xff]  ;;  %v530_v39 = vld [vmem:[%s6125_s3 + $0x78] sm:$0xff] }
 0x170   : > { %4122 = vmatpush3.bf16.msra.mxu0 %v5120_v29 }
 0x171   : > { %4124 = vmatprep.subr.bf16.mxu0 %v5130_v35 }
 0x172   : > { %3565 = vmatmul.mubr.msk.f32.gmra.mrb[30].mxu0 %vm841_vm0, %v3454_v49  ;;  %3621 = vmatmul.mubr.msk.f32.gmra.mrb[30].mxu1 %vm841_vm0, %v3510_v47  ;;  %v5150_v47 = vpack.c.bf16 %v522_v45, %v521_v43  ;;  %v523_v49 = vld [vmem:[%s6125_s3 + $0x40] sm:$0xff]  ;;  %v5190_v43 = vpack.c.bf16 %v530_v39, %v529_v37 }
 0x173   : > { %3655 = vmatprep.mubr.f32.mxu0 %v4777_v12  ;;  %v5160_v53 = vpack.c.bf16 %v524_v51, %v523_v49 }
 0x174   : > { %4126 = vmatpush3.bf16.msra.mxu0 %v5130_v35 }
 0x175   : > { %4128 = vmatprep.subr.bf16.mxu0 %v5140_v41 }
 0x178   : > { %4130 = vmatpush3.bf16.msra.mxu0 %v5140_v41 }
 0x179   : > { %4132 = vmatprep.subr.bf16.mxu0 %v5150_v47 }
 0x17c   : > { %4134 = vmatpush3.bf16.msra.mxu0 %v5150_v47 }
 0x17d   : > { %4136 = vmatprep.subr.bf16.mxu0 %v5160_v53 }
 0x180   : > { %4138 = vmatpush3.bf16.msra.mxu0 %v5160_v53 }
 0x181   : > { %4140 = vmatprep.subr.bf16.mxu0 %v5170_v25 }
 0x184   : > { %4142 = vmatpush3.bf16.msra.mxu0 %v5170_v25 }
 0x185   : > { %4144 = vmatprep.subr.bf16.mxu0 %v5180_v33 }
 0x188   : > { %4146 = vmatpush3.bf16.msra.mxu0 %v5180_v33 }
 0x189   : > { %4148 = vmatprep.subr.bf16.mxu0 %v5190_v43 }
 0x18c   : > { %4150 = vmatpush3.bf16.msra.mxu0 %v5190_v43 }
 0x18f   : > { %3656 = vmatmul.mubr.f32.vlgmr.msra.gmra.mrb[32].mxu0 %v4806_v27 }
 0x190   : > { %3658 = vmatprep.mubr.f32.mxu0 %v4809_v28 }
 0x193   : > { %3659 = vmatmul.mubr.f32.gmra.mrb[34].mxu0 %v4815_v30 }
 0x194   : > { %3661 = vmatprep.mubr.f32.mxu0 %v4819_v32 }
 0x197   : > { %3662 = vmatmul.mubr.f32.gmra.mrb[36].mxu0 %v4825_v34 }
 0x198   : > { %3664 = vmatprep.mubr.f32.mxu0 %v4829_v36 }
 0x19b   : > { %3665 = vmatmul.mubr.f32.gmra.mrb[38].mxu0 %v4835_v38 }
 0x19c   : > { %3667 = vmatprep.mubr.f32.mxu0 %v4839_v40 }
 0x19f   : > { %3668 = vmatmul.mubr.f32.gmra.mrb[40].mxu0 %v4845_v42 }
 0x1a0   : > { %3670 = vmatprep.mubr.f32.mxu0 %v4849_v44 }
 0x1a3   : > { %3671 = vmatmul.mubr.f32.gmra.mrb[42].mxu0 %v4855_v46 }
 0x1a4   : > { %3673 = vmatprep.mubr.f32.mxu0 %v4859_v48 }
 0x1a7   : > { %3674 = vmatmul.mubr.f32.gmra.mrb[44].mxu0 %v4865_v50 }
 0x1a8   : > { %3676 = vmatprep.mubr.f32.mxu0 %v4869_v52 }
 0x1ab   : > { %3677 = vmatmul.mubr.f32.gmra.mrb[46].mxu0 %v4875_v54 }
 0x229   : > { %v5034_v56 = vpop.f32.mrb[16].mxu0  ;;  %v5036_v57 = vpop.f32.mrb[16].mxu1 }
 0x22a   : > { %v5038_v59 = vpop.f32.mrb[17].mxu0  ;;  %v5040_v60 = vpop.f32.mrb[17].mxu1 }
 0x22b   : > { %1228 = vmax.xlane.f32.xlu0 %v5038_v59 }
 0x22d   : > { %v5043_v61 = vpop.f32.mrb[18].mxu0  ;;  %v5045_v62 = vpop.f32.mrb[18].mxu1 }
 0x22e   : > { %v5047_v63 = vpop.f32.mrb[19].mxu0  ;;  %v5049_v0 = vpop.f32.mrb[19].mxu1 }
 0x22f   : > { %1230 = vmax.xlane.f32.xlu0 %v5034_v56  ;;  %1232 = vmax.xlane.f32.xlu1 %v5047_v63 }
 0x231   : > { %v5053_v12 = vpop.f32.mrb[20].mxu0  ;;  %v5055_v1 = vpop.f32.mrb[20].mxu1 }
 0x232   : > { %v5057_v2 = vpop.f32.mrb[21].mxu0  ;;  %v5059_v3 = vpop.f32.mrb[21].mxu1 }
 0x233   : > { %1234 = vmax.xlane.f32.xlu1 %v5043_v61  ;;  %1236 = vmax.xlane.f32.xlu0 %v5057_v2 }
 0x235   : > { %v5063_v4 = vpop.f32.mrb[22].mxu0  ;;  %v5065_v5 = vpop.f32.mrb[22].mxu1 }
 0x236   : > { %v5067_v6 = vpop.f32.mrb[23].mxu0  ;;  %v5069_v7 = vpop.f32.mrb[23].mxu1 }
 0x237   : > { %1238 = vmax.xlane.f32.xlu1 %v5053_v12  ;;  %1240 = vmax.xlane.f32.xlu0 %v5067_v6 }
 0x239   : > { %v5073_v8 = vpop.f32.mrb[24].mxu0  ;;  %v5075_v9 = vpop.f32.mrb[24].mxu1 }
 0x23a   : > { %v5077_v10 = vpop.f32.mrb[25].mxu0  ;;  %v5079_v11 = vpop.f32.mrb[25].mxu1 }
 0x23b   : > { %1242 = vmax.xlane.f32.xlu1 %v5063_v4  ;;  %1244 = vmax.xlane.f32.xlu0 %v5077_v10 }
 0x23d   : > { %v5083_v13 = vpop.f32.mrb[26].mxu0  ;;  %v5085_v14 = vpop.f32.mrb[26].mxu1 }
 0x23e   : > { %v5087_v15 = vpop.f32.mrb[27].mxu0  ;;  %v5089_v16 = vpop.f32.mrb[27].mxu1 }
 0x23f   : > { %1246 = vmax.xlane.f32.xlu1 %v5073_v8  ;;  %1248 = vmax.xlane.f32.xlu0 %v5087_v15 }
 0x241   : > { %v5093_v17 = vpop.f32.mrb[28].mxu0  ;;  %v5095_v18 = vpop.f32.mrb[28].mxu1 }
 0x242   : > { %v5097_v19 = vpop.f32.mrb[29].mxu0  ;;  %v5099_v20 = vpop.f32.mrb[29].mxu1 }
 0x243   : > { %1250 = vmax.xlane.f32.xlu1 %v5083_v13  ;;  %1252 = vmax.xlane.f32.xlu0 %v5097_v19 }
 0x245   : > { %v5103_v21 = vpop.f32.mrb[30].mxu0  ;;  %v5105_v22 = vpop.f32.mrb[30].mxu1 }
 0x246   : > { %v5107_v23 = vpop.f32.mrb[31].mxu0  ;;  %v5109_v24 = vpop.f32.mrb[31].mxu1 }
 0x247   : > { %1254 = vmax.xlane.f32.xlu1 %v5093_v17  ;;  %1256 = vmax.xlane.f32.xlu0 %v5107_v23 }
 0x24b   : > { %1258 = vmax.xlane.f32.xlu1 %v5103_v21 }
 0x2b8   : > { %v1229_v45 = vpop.xlane.xlu0 %1228 }
 0x2b9   : > { %v1260_v49 = vsub.f32 %v5038_v59, %v1229_v45 }
 0x2bb   : > { %v1276_v51 = vmul.f32 1.442695, %v1260_v49 }
 0x2bc   : > { %v1231_v27 = vpop.xlane.xlu0 %1230  ;;  %v1233_v28 = vpop.xlane.xlu1 %1232 }
 0x2bd   : > { %4357 = vpow2.f32 %v1276_v51  ;;  %v1261_v30 = vsub.f32 %v5034_v56, %v1231_v27  ;;  %v1262_v32 = vsub.f32 %v5047_v63, %v1233_v28 }
 0x2bf   : > { %v1278_v34 = vmul.f32 1.442695, %v1261_v30  ;;  %v1280_v36 = vmul.f32 1.442695, %v1262_v32 }
 0x2c0   : > { %v1235_v38 = vpop.xlane.xlu1 %1234  ;;  %v1237_v40 = vpop.xlane.xlu0 %1236 }
 0x2c1   : > { %4359 = vpow2.f32 %v1278_v34  ;;  %v1263_v42 = vsub.f32 %v5043_v61, %v1235_v38  ;;  %v1264_v59 = vsub.f32 %v5057_v2, %v1237_v40 }
 0x2c2   : > { %4361 = vpow2.f32 %v1280_v36 }
 0x2c3   : > { %v1282_v44 = vmul.f32 1.442695, %v1263_v42  ;;  %v1284_v55 = vmul.f32 1.442695, %v1264_v59 }
 0x2c4   : > { %v1239_v56 = vpop.xlane.xlu1 %1238  ;;  %v1241_v63 = vpop.xlane.xlu0 %1240 }
 0x2c5   : > { %4363 = vpow2.f32 %v1282_v44  ;;  %v1265_v46 = vsub.f32 %v5053_v12, %v1239_v56  ;;  %v1266_v58 = vsub.f32 %v5067_v6, %v1241_v63 }
 0x2c6   : > { %4365 = vpow2.f32 %v1284_v55 }
 0x2c7   : > { %v5215_v48 = vpop.eup %4357  ;;  %v1286_v61 = vmul.f32 1.442695, %v1265_v46  ;;  %v1288_v26 = vmul.f32 1.442695, %v1266_v58 }
 0x2c8   : > { %v1243_v2 = vpop.xlane.xlu1 %1242  ;;  %v1245_v31 = vpop.xlane.xlu0 %1244  ;;  %1308 = vadd.xlane.f32.xlu0 %v5215_v48 }
 0x2c9   : > { %4367 = vpow2.f32 %v1286_v61  ;;  %v1267_v50 = vsub.f32 %v5063_v4, %v1243_v2  ;;  %v1268_v52 = vsub.f32 %v5077_v10, %v1245_v31 }
 0x2ca   : > { %4369 = vpow2.f32 %v1288_v26 }
 0x2cb   : > { %v5221_v12 = vpop.eup %4359  ;;  %v1290_v6 = vmul.f32 1.442695, %v1267_v50  ;;  %v1292_v37 = vmul.f32 1.442695, %v1268_v52 }
 0x2cc   : > { %v5223_v39 = vpop.eup %4361  ;;  %v1247_v45 = vpop.xlane.xlu1 %1246  ;;  %1310 = vadd.xlane.f32.xlu1 %v5221_v12 }
 0x2cd   : > { %v1249_v49 = vpop.xlane.xlu0 %1248  ;;  %4371 = vpow2.f32 %v1290_v6  ;;  %v1269_v54 = vsub.f32 %v5073_v8, %v1247_v45  ;;  %1312 = vadd.xlane.f32.xlu0 %v5223_v39 }
 0x2ce   : > { %v1270_v51 = vsub.f32 %v5087_v15, %v1249_v49  ;;  %4373 = vpow2.f32 %v1292_v37 }
 0x2cf   : > { %v5229_v4 = vpop.eup %4363  ;;  %v1294_v10 = vmul.f32 1.442695, %v1269_v54 }
 0x2d0   : > { %v1296_v27 = vmul.f32 1.442695, %v1270_v51  ;;  %v5231_v28 = vpop.eup %4365  ;;  %v1251_v30 = vpop.xlane.xlu1 %1250  ;;  %1314 = vadd.xlane.f32.xlu1 %v5229_v4 }
 0x2d1   : > { %v1253_v32 = vpop.xlane.xlu0 %1252  ;;  %4375 = vpow2.f32 %v1294_v10  ;;  %v1271_v34 = vsub.f32 %v5083_v13, %v1251_v30  ;;  %1316 = vadd.xlane.f32.xlu0 %v5231_v28 }
 0x2d2   : > { %v1272_v8 = vsub.f32 %v5097_v19, %v1253_v32  ;;  %4377 = vpow2.f32 %v1296_v27 }
 0x2d3   : > { %v5237_v15 = vpop.eup %4367  ;;  %v1298_v36 = vmul.f32 1.442695, %v1271_v34 }
 0x2d4   : > { %v1300_v38 = vmul.f32 1.442695, %v1272_v8  ;;  %v5239_v40 = vpop.eup %4369  ;;  %v1255_v42 = vpop.xlane.xlu1 %1254  ;;  %1318 = vadd.xlane.f32.xlu1 %v5237_v15 }
 0x2d5   : > { %v1257_v59 = vpop.xlane.xlu0 %1256  ;;  %4379 = vpow2.f32 %v1298_v36  ;;  %v1273_v44 = vsub.f32 %v5093_v17, %v1255_v42  ;;  %1320 = vadd.xlane.f32.xlu0 %v5239_v40 }
 0x2d6   : > { %v1274_v13 = vsub.f32 %v5107_v23, %v1257_v59  ;;  %4381 = vpow2.f32 %v1300_v38 }
 0x2d7   : > { %v5245_v19 = vpop.eup %4371  ;;  %v1302_v55 = vmul.f32 1.442695, %v1273_v44 }
 0x2d8   : > { %v1304_v56 = vmul.f32 1.442695, %v1274_v13  ;;  %v5247_v63 = vpop.eup %4373  ;;  %1322 = vadd.xlane.f32.xlu1 %v5245_v19  ;;  %v1259_v46 = vpop.xlane.xlu1 %1258 }
 0x2d9   : > { %4383 = vpow2.f32 %v1302_v55  ;;  %v1275_v58 = vsub.f32 %v5103_v21, %v1259_v46  ;;  %1324 = vadd.xlane.f32.xlu0 %v5247_v63 }
 0x2da   : > { %4385 = vpow2.f32 %v1304_v56 }
 0x2db   : > { %v5252_v17 = vpop.eup %4375  ;;  %v1306_v61 = vmul.f32 1.442695, %v1275_v58 }
 0x2dc   : > { %v5254_v23 = vpop.eup %4377  ;;  %1326 = vadd.xlane.f32.xlu1 %v5252_v17 }
 0x2dd   : > { %4387 = vpow2.f32 %v1306_v61  ;;  %1328 = vadd.xlane.f32.xlu0 %v5254_v23 }
 0x2df   : > { %v5258_v26 = vpop.eup %4379 }
 0x2e0   : > { %v5260_v2 = vpop.eup %4381  ;;  %1330 = vadd.xlane.f32.xlu1 %v5258_v26 }
 0x2e1   : > { %1332 = vadd.xlane.f32.xlu0 %v5260_v2 }
 0x2e3   : > { %v5264_v21 = vpop.eup %4383 }
 0x2e4   : > { %v5266_v31 = vpop.eup %4385  ;;  %1334 = vadd.xlane.f32.xlu1 %v5264_v21 }
 0x2e5   : > { %1336 = vadd.xlane.f32.xlu0 %v5266_v31 }
 0x2e7   : > { %v5270_v50 = vpop.eup %4387 }
 0x2e8   : > { %1338 = vadd.xlane.f32.xlu1 %v5270_v50 }
 0x2ec   : > { %1411 = vmax.xlane.f32.xlu1 %v5040_v60 }
 0x2f0   : > { %1413 = vmax.xlane.f32.xlu1 %v5036_v57 }
 0x2f4   : > { %1415 = vmax.xlane.f32.xlu1 %v5049_v0 }
 0x2f8   : > { %1417 = vmax.xlane.f32.xlu1 %v5045_v62 }
 0x2fc   : > { %1419 = vmax.xlane.f32.xlu1 %v5059_v3 }
 0x300   : > { %1421 = vmax.xlane.f32.xlu1 %v5055_v1 }
 0x304   : > { %1423 = vmax.xlane.f32.xlu1 %v5069_v7 }
 0x308   : > { %1425 = vmax.xlane.f32.xlu1 %v5065_v5 }
 0x30c   : > { %1427 = vmax.xlane.f32.xlu1 %v5079_v11 }
 0x310   : > { %1429 = vmax.xlane.f32.xlu1 %v5075_v9 }
 0x314   : > { %1431 = vmax.xlane.f32.xlu1 %v5089_v16 }
 0x318   : > { %1433 = vmax.xlane.f32.xlu1 %v5085_v14 }
 0x31c   : > { %1435 = vmax.xlane.f32.xlu1 %v5099_v20 }
 0x320   : > { %1437 = vmax.xlane.f32.xlu1 %v5095_v18 }
 0x324   : > { %1439 = vmax.xlane.f32.xlu1 %v5109_v24 }
 0x328   : > { %1441 = vmax.xlane.f32.xlu1 %v5105_v22 }
 0x355   : > { %v1309_v52 = vpop.xlane.xlu0 %1308 }
 0x356   : > { %4389 = vrcp.f32 %v1309_v52 }
 0x359   : > { %v1311_v6 = vpop.xlane.xlu1 %1310 }
 0x35a   : > { %4391 = vrcp.f32 %v1311_v6  ;;  %v1313_v37 = vpop.xlane.xlu0 %1312 }
 0x35b   : > { %4393 = vrcp.f32 %v1313_v37 }
 0x35d   : > { %v1315_v45 = vpop.xlane.xlu1 %1314 }
 0x35e   : > { %4395 = vrcp.f32 %v1315_v45  ;;  %v1317_v49 = vpop.xlane.xlu0 %1316 }
 0x35f   : > { %4397 = vrcp.f32 %v1317_v49 }
 0x360   : > { %v4390_v51 = vpop.eup %4389 }
 0x361   : > { %v1319_v54 = vpop.xlane.xlu1 %1318  ;;  %v5290_v34 = vmul.f32 %v4390_v51, %v5215_v48 }
 0x362   : > { %4399 = vrcp.f32 %v1319_v54  ;;  %v1321_v10 = vpop.xlane.xlu0 %1320 }
 0x363   : > { %4401 = vrcp.f32 %v1321_v10 }
 0x364   : > { %v4392_v27 = vpop.eup %4391 }
 0x365   : > { %v4394_v30 = vpop.eup %4393  ;;  %v1323_v32 = vpop.xlane.xlu1 %1322  ;;  %v5293_v8 = vmul.f32 %v4392_v27, %v5221_v12 }
 0x366   : > { %4403 = vrcp.f32 %v1323_v32  ;;  %v1325_v36 = vpop.xlane.xlu0 %1324  ;;  %v5296_v38 = vmul.f32 %v4394_v30, %v5223_v39 }
 0x367   : > { %4405 = vrcp.f32 %v1325_v36  ;;  %v1372_v42 = vadd.f32 %v5293_v8, %v5290_v34 }
 0x368   : > { %v4396_v59 = vpop.eup %4395 }
 0x369   : > { %v4398_v44 = vpop.eup %4397  ;;  %v1327_v13 = vpop.xlane.xlu1 %1326  ;;  %v5301_v55 = vmul.f32 %v4396_v59, %v5229_v4  ;;  %v1373_v48 = vadd.f32 %v1372_v42, %v5296_v38 }
 0x36a   : > { %4407 = vrcp.f32 %v1327_v13  ;;  %v1329_v12 = vpop.xlane.xlu0 %1328  ;;  %v5305_v56 = vmul.f32 %v4398_v44, %v5231_v28 }
 0x36b   : > { %4409 = vrcp.f32 %v1329_v12  ;;  %v1374_v39 = vadd.f32 %v1373_v48, %v5301_v55 }
 0x36c   : > { %v4400_v46 = vpop.eup %4399 }
 0x36d   : > { %v4402_v58 = vpop.eup %4401  ;;  %v5309_v61 = vmul.f32 %v4400_v46, %v5237_v15  ;;  %v1331_v52 = vpop.xlane.xlu1 %1330  ;;  %v1375_v6 = vadd.f32 %v1374_v39, %v5305_v56 }
 0x36e   : > { %4411 = vrcp.f32 %v1331_v52  ;;  %v1333_v4 = vpop.xlane.xlu0 %1332  ;;  %v5313_v37 = vmul.f32 %v4402_v58, %v5239_v40 }
 0x36f   : > { %4413 = vrcp.f32 %v1333_v4  ;;  %v1376_v28 = vadd.f32 %v1375_v6, %v5309_v61  ;;  %v5344_v6 = vld [vmem:[%s6126_s4] ss:$0 sm:$0xff] }
 0x370   : > { %v4404_v45 = vpop.eup %4403 }
 0x371   : > { %v4406_v49 = vpop.eup %4405  ;;  %v5317_v54 = vmul.f32 %v4404_v45, %v5245_v19  ;;  %v1335_v51 = vpop.xlane.xlu1 %1334  ;;  %v1377_v15 = vadd.f32 %v1376_v28, %v5313_v37 }
 0x372   : > { %4415 = vrcp.f32 %v1335_v51  ;;  %v1337_v10 = vpop.xlane.xlu0 %1336  ;;  %v5321_v27 = vmul.f32 %v4406_v49, %v5247_v63 }
 0x373   : > { %4417 = vrcp.f32 %v1337_v10  ;;  %v1378_v40 = vadd.f32 %v1377_v15, %v5317_v54 }
 0x374   : > { %v4408_v30 = vpop.eup %4407 }
 0x375   : > { %v4410_v32 = vpop.eup %4409  ;;  %v5325_v36 = vmul.f32 %v4408_v30, %v5252_v17  ;;  %v1339_v42 = vpop.xlane.xlu1 %1338  ;;  %v1379_v19 = vadd.f32 %v1378_v40, %v5321_v27 }
 0x376   : > { %4419 = vrcp.f32 %v1339_v42  ;;  %v5329_v59 = vmul.f32 %v4410_v32, %v5254_v23 }
 0x377   : > { %v1380_v44 = vadd.f32 %v1379_v19, %v5325_v36 }
 0x378   : > { %v4412_v13 = vpop.eup %4411 }
 0x379   : > { %v4414_v63 = vpop.eup %4413  ;;  %v5333_v48 = vmul.f32 %v4412_v13, %v5258_v26  ;;  %v1412_v12 = vpop.xlane.xlu1 %1411  ;;  %v1381_v39 = vadd.f32 %v1380_v44, %v5329_v59 }
 0x37a   : > { %v1443_v17 = vsub.f32 %v5040_v60, %v1412_v12  ;;  %v5338_v46 = vmul.f32 %v4414_v63, %v5260_v2  ;;  %v3657_v2 = vpop.f32.mrb[32].mxu0 }
 0x37b   : > { %v1382_v58 = vadd.f32 %v1381_v39, %v5333_v48  ;;  %v1672_v15 = vadd.f32 %v3657_v2, %v5344_v6  ;;  %v1666_v10 = vpop.f32.mrb[33].mxu0 }
 0x37c   : > { %v4416_v52 = vpop.eup %4415  ;;  %v1459_v23 = vmul.f32 1.442695, %v1443_v17  ;;  %v3660_v44 = vpop.f32.mrb[34].mxu0 }
 0x37d   : > { %v4418_v4 = vpop.eup %4417  ;;  %v5347_v26 = vmul.f32 %v4416_v52, %v5264_v21  ;;  %v1414_v28 = vpop.xlane.xlu1 %1413  ;;  %v1383_v45 = vadd.f32 %v1382_v58, %v5338_v46  ;;  %v1667_v21 = vadd.f32 %v5344_v6, %v1666_v10  ;;  %v1682_v63 = vadd.f32 %v3660_v44, %v5344_v6 }
 0x37e   : > { %4421 = vpow2.f32 %v1459_v23  ;;  %v1444_v60 = vsub.f32 %v5036_v57, %v1414_v28  ;;  %v5352_v49 = vmul.f32 %v4418_v4, %v5266_v31  ;;  %v1676_v12 = vpop.f32.mrb[35].mxu0 }
 0x37f   : > { %v1384_v51 = vadd.f32 %v1383_v45, %v5347_v26  ;;  %v4151_v31 = vpack.c.bf16 %v1672_v15, %v1667_v21  ;;  %v1677_v17 = vadd.f32 %v5344_v6, %v1676_v12  ;;  %v3663_v4 = vpop.f32.mrb[36].mxu0 }
 0x380   : > { %v4420_v40 = vpop.eup %4419  ;;  %v1461_v30 = vmul.f32 1.442695, %v1444_v60  ;;  %v1692_v28 = vadd.f32 %v3663_v4, %v5344_v6  ;;  %v1686_v45 = vpop.f32.mrb[37].mxu0 }
 0x381   : > { %v5358_v32 = vmul.f32 %v4420_v40, %v5270_v50  ;;  %v1416_v42 = vpop.xlane.xlu1 %1415  ;;  %v1385_v19 = vadd.f32 %v1384_v51, %v5352_v49  ;;  %4152 = vmatprep.subr.bf16.mxu1 %v4151_v31  ;;  %v4155_v23 = vpack.c.bf16 %v1682_v63, %v1677_v17  ;;  %v1687_v51 = vadd.f32 %v5344_v6, %v1686_v45 }
 0x382   : > { %4423 = vpow2.f32 %v1461_v30  ;;  %v1445_v57 = vsub.f32 %v5049_v0, %v1416_v42  ;;  %4154 = vmatpush3.bf16.msra.mxu1 %v4151_v31  ;;  %v3666_v30 = vpop.f32.mrb[38].mxu0 }
 0x383   : > { %v1386_v13 = vadd.f32 %v1385_v19, %v5358_v32  ;;  %4156 = vmatprep.subr.bf16.mxu1 %v4155_v23  ;;  %v4159_v40 = vpack.c.bf16 %v1692_v28, %v1687_v51  ;;  %v1702_v42 = vadd.f32 %v3666_v30, %v5344_v6  ;;  %v1696_v19 = vpop.f32.mrb[39].mxu0 }
 0x384   : > { %v1463_v39 = vmul.f32 1.442695, %v1445_v57  ;;  %v1697_v44 = vadd.f32 %v5344_v6, %v1696_v19 }
 0x385   : > { %v1418_v58 = vpop.xlane.xlu1 %1417  ;;  %v1387_v50 = vrot.slane %v1386_v13, 4 }
 0x386   : > { %4425 = vpow2.f32 %v1463_v39  ;;  %v1446_v52 = vsub.f32 %v5045_v62, %v1418_v58  ;;  %4158 = vmatpush3.bf16.msra.mxu1 %v4155_v23  ;;  %v4163_v12 = vpack.c.bf16 %v1702_v42, %v1697_v44  ;;  %v3669_v39 = vpop.f32.mrb[40].mxu0 }
 0x387   : > { %v1388_v0 = vadd.f32 %v1387_v50, %v1386_v13  ;;  %4160 = vmatprep.subr.bf16.mxu1 %v4159_v40  ;;  %v1712_v58 = vadd.f32 %v3669_v39, %v5344_v6  ;;  %v1706_v50 = vpop.f32.mrb[41].mxu0 }
 0x388   : > { %v5367_v60 = vpop.eup %4421  ;;  %v1465_v2 = vmul.f32 1.442695, %v1446_v52  ;;  %v1707_v4 = vadd.f32 %v5344_v6, %v1706_v50 }
 0x389   : > { %1491 = vadd.xlane.f32.xlu1 %v5367_v60  ;;  %v1420_v15 = vpop.xlane.xlu1 %1419  ;;  %v1389_v10 = vrot.slane %v1388_v0, 2 }
 0x38a   : > { %4427 = vpow2.f32 %v1465_v2  ;;  %v1447_v62 = vsub.f32 %v5059_v3, %v1420_v15  ;;  %4162 = vmatpush3.bf16.msra.mxu1 %v4159_v40  ;;  %v4167_v45 = vpack.c.bf16 %v1712_v58, %v1707_v4  ;;  %v3672_v2 = vpop.f32.mrb[42].mxu0 }
 0x38b   : > { %v1390_v21 = vadd.f32 %v1389_v10, %v1388_v0  ;;  %4164 = vmatprep.subr.bf16.mxu1 %v4163_v12  ;;  %v1722_v51 = vadd.f32 %v3672_v2, %v5344_v6  ;;  %v1716_v15 = vpop.f32.mrb[43].mxu0 }
 0x38c   : > { %v5373_v57 = vpop.eup %4423  ;;  %v1467_v31 = vmul.f32 1.442695, %v1447_v62  ;;  %v1717_v40 = vadd.f32 %v5344_v6, %v1716_v15  ;;  %v3675_v42 = vpop.f32.mrb[44].mxu0 }
 0x38d   : > { %1493 = vadd.xlane.f32.xlu1 %v5373_v57  ;;  %v1422_v13 = vpop.xlane.xlu1 %1421  ;;  %v1391_v63 = vrot.slane %v1390_v21, 1  ;;  %v1732_v44 = vadd.f32 %v3675_v42, %v5344_v6 }
 0x38e   : > { %4429 = vpow2.f32 %v1467_v31  ;;  %v1448_v3 = vsub.f32 %v5055_v1, %v1422_v13  ;;  %4166 = vmatpush3.bf16.msra.mxu1 %v4163_v12  ;;  %v1726_v13 = vpop.f32.mrb[45].mxu0 }
 0x38f   : > { %v1392_v17 = vadd.f32 %v1391_v63, %v1390_v21  ;;  %4168 = vmatprep.subr.bf16.mxu1 %v4167_v45  ;;  %v4171_v21 = vpack.c.bf16 %v1722_v51, %v1717_v40  ;;  %v3678_v39 = vpop.f32.mrb[46].mxu0 }
 0x390   : > { %v5379_v52 = vpop.eup %4425  ;;  %v1469_v23 = vmul.f32 1.442695, %v1448_v3  ;;  %v1727_v3 = vadd.f32 %v5344_v6, %v1726_v13  ;;  %v1736_v50 = vpop.f32.mrb[47].mxu0 }
 0x391   : > { %1495 = vadd.xlane.f32.xlu1 %v5379_v52  ;;  %v1424_v0 = vpop.xlane.xlu1 %1423  ;;  %v1393_v28 = vadd.f32 1e-09, %v1392_v17 }
 0x392   : > { %4431 = vpow2.f32 %v1469_v23  ;;  %v1449_v1 = vsub.f32 %v5069_v7, %v1424_v0  ;;  %4170 = vmatpush3.bf16.msra.mxu1 %v4167_v45  ;;  %v4175_v12 = vpack.c.bf16 %v1732_v44, %v1727_v3  ;;  %v1742_v0 = vadd.f32 %v3678_v39, %v5344_v6 }
 0x393   : > { %4433 = vrcp.f32 %v1393_v28  ;;  %4172 = vmatprep.subr.bf16.mxu1 %v4171_v21  ;;  %v1737_v28 = vadd.f32 %v5344_v6, %v1736_v50 }
 0x394   : > { %v5385_v10 = vpop.eup %4427  ;;  %v1471_v62 = vmul.f32 1.442695, %v1449_v1 }
 0x395   : > { %1497 = vadd.xlane.f32.xlu1 %v5385_v10  ;;  %v1426_v30 = vpop.xlane.xlu1 %1425 }
 0x396   : > { %4435 = vpow2.f32 %v1471_v62  ;;  %v1450_v7 = vsub.f32 %v5065_v5, %v1426_v30  ;;  %4174 = vmatpush3.bf16.msra.mxu1 %v4171_v21 }
 0x397   : > { %4176 = vmatprep.subr.bf16.mxu1 %v4175_v12 }
 0x398   : > { %v5393_v19 = vpop.eup %4429  ;;  %v1473_v31 = vmul.f32 1.442695, %v1450_v7 }
 0x399   : > { %1499 = vadd.xlane.f32.xlu1 %v5393_v19  ;;  %v1428_v63 = vpop.xlane.xlu1 %1427 }
 0x39a   : > { %4437 = vpow2.f32 %v1473_v31  ;;  %v1451_v5 = vsub.f32 %v5079_v11, %v1428_v63  ;;  %4178 = vmatpush3.bf16.msra.mxu1 %v4175_v12 }
 0x39c   : > { %v5400_v17 = vpop.eup %4431  ;;  %v1475_v58 = vmul.f32 1.442695, %v1451_v5 }
 0x39d   : > { %v4434_v23 = vpop.eup %4433  ;;  %1501 = vadd.xlane.f32.xlu1 %v5400_v17  ;;  %v1430_v4 = vpop.xlane.xlu1 %1429 }
 0x39e   : > { %4439 = vpow2.f32 %v1475_v58  ;;  %v1452_v11 = vsub.f32 %v5075_v9, %v1430_v4  ;;  %v1395_v1 = vmul.f32 %v4434_v23, %v5290_v34  ;;  %v1396_v45 = vmul.f32 %v4434_v23, %v5293_v8 }
 0x39f   : > { %v1397_v2 = vmul.f32 %v4434_v23, %v5296_v38  ;;  %v1398_v51 = vmul.f32 %v4434_v23, %v5301_v55  ;;  %v1399_v15 = vmul.f32 %v4434_v23, %v5305_v56  ;;  %v5412_v62 = vmul.f32 %v4434_v23, %v5309_v61 }
 0x3a0   : > { %v5414_v40 = vpop.eup %4435  ;;  %v1477_v6 = vmul.f32 1.442695, %v1452_v11  ;;  %1745 = vxpose.xlu0.b32.start [1/16] %v1395_v1, 128  ;;  %2744 = vst [vmem:[%s5418_s29] sm:$0xff] %v1395_v1  ;;  %2745 = vst [vmem:[%s5418_s29 + $0x8] sm:$0xff] %v1396_v45  ;;  %v5423_v9 = vmul.f32 %v4434_v23, %v5313_v37  ;;  %v5426_v34 = vmul.f32 %v4434_v23, %v5317_v54 }
 0x3a1   : > { %v5429_v8 = vmul.f32 %v4434_v23, %v5321_v27  ;;  %1503 = vadd.xlane.f32.xlu1 %v5414_v40  ;;  %v1432_v38 = vpop.xlane.xlu1 %1431  ;;  %2746 = vst [vmem:[%s5418_s29 + $0x10] sm:$0xff] %v1397_v2  ;;  %2747 = vst [vmem:[%s5418_s29 + $0x18] sm:$0xff] %v1398_v51  ;;  %v5438_v55 = vmul.f32 %v4434_v23, %v5325_v36  ;;  %v5441_v56 = vmul.f32 %v4434_v23, %v5329_v59 }
 0x3a2   : > { %2748 = vst [vmem:[%s5418_s29 + $0x20] sm:$0xff] %v1399_v15  ;;  %2749 = vst [vmem:[%s5418_s29 + $0x28] sm:$0xff] %v5412_v62  ;;  %v5444_v61 = vmul.f32 %v4434_v23, %v5333_v48  ;;  %v5447_v37 = vmul.f32 %v4434_v23, %v5338_v46  ;;  %4441 = vpow2.f32 %v1477_v6  ;;  %v1453_v54 = vsub.f32 %v5089_v16, %v1432_v38 }
 0x3a3   : > { %2750 = vst [vmem:[%s5418_s29 + $0x30] sm:$0xff] %v5423_v9  ;;  %2751 = vst [vmem:[%s5418_s29 + $0x38] sm:$0xff] %v5426_v34  ;;  %v1408_v27 = vmul.f32 %v4434_v23, %v5347_v26  ;;  %v1409_v36 = vmul.f32 %v4434_v23, %v5352_v49  ;;  %v1410_v16 = vmul.f32 %v4434_v23, %v5358_v32 }
 0x3a4   : > { %2752 = vst [vmem:[%s5418_s29 + $0x40] sm:$0xff] %v5429_v8  ;;  %2753 = vst [vmem:[%s5418_s29 + $0x48] sm:$0xff] %v5438_v55  ;;  %v4179_v59 = vpack.c.bf16 %v1742_v0, %v1737_v28  ;;  %v5467_v48 = vpop.eup %4437  ;;  %v1479_v46 = vmul.f32 1.442695, %v1453_v54  ;;  %1746 = vxpose.xlu0.b32.cont [2/16] %v1396_v45, 128  ;;  %v536_v54 = vld [vmem:[%s6100_s5 + $0x20] sm:$0xff] }
 0x3a5   : > { %2754 = vst [vmem:[%s5418_s29 + $0x50] sm:$0xff] %v5441_v56  ;;  %2755 = vst [vmem:[%s5418_s29 + $0x58] sm:$0xff] %v5444_v61  ;;  %1505 = vadd.xlane.f32.xlu1 %v5467_v48  ;;  %v1434_v26 = vpop.xlane.xlu1 %1433 }
 0x3a6   : > { %2756 = vst [vmem:[%s5418_s29 + $0x60] sm:$0xff] %v5447_v37  ;;  %2757 = vst [vmem:[%s5418_s29 + $0x68] sm:$0xff] %v1408_v27  ;;  %4180 = vmatprep.subr.bf16.mxu1 %v4179_v59  ;;  %4443 = vpow2.f32 %v1479_v46  ;;  %v1454_v49 = vsub.f32 %v5085_v14, %v1434_v26 }
 0x3a7   : > { %2758 = vst [vmem:[%s5418_s29 + $0x70] sm:$0xff] %v1409_v36  ;;  %2759 = vst [vmem:[%s5418_s29 + $0x78] sm:$0xff] %v1410_v16  ;;  %4182 = vmatpush3.bf16.msra.mxu1 %v4179_v59  ;;  %v539_v59 = vld [vmem:[%s6100_s5 + $0x38] sm:$0xff]  ;;  %s4528_s29 = scalar_lea.vmem %s4527_s30, 4096 }
 0x3a8   : > { %4216 = vmatprep.subr.bf16.mxu1 %v5120_v29  ;;  %v5475_v30 = vpop.eup %4439  ;;  %1747 = vxpose.xlu0.b32.cont [3/16] %v1397_v2, 128  ;;  %v1481_v50 = vmul.f32 1.442695, %v1454_v49  ;;  %v540_v49 = vld [vmem:[%s6100_s5 + $0x40] sm:$0xff] }
 0x3a9   : > { %1507 = vadd.xlane.f32.xlu1 %v5475_v30  ;;  %v1436_v32 = vpop.xlane.xlu1 %1435 }
 0x3aa   : > { %v1455_v7 = vsub.f32 %v5099_v20, %v1436_v32  ;;  %v541_v32 = vld [vmem:[%s6100_s5 + $0x48] sm:$0xff] }
 0x3ac   : > { %v5479_v21 = vpop.eup %4441  ;;  %v1483_v42 = vmul.f32 1.442695, %v1455_v7  ;;  %1748 = vxpose.xlu0.b32.cont [4/16] %v1398_v51, 128  ;;  %v5575_v7 = vpack.c.bf16 %v541_v32, %v540_v49 }
 0x3ad   : > { %1509 = vadd.xlane.f32.xlu1 %v5479_v21  ;;  %v1438_v31 = vpop.xlane.xlu1 %1437 }
 0x3ae   : > { %4445 = vpow2.f32 %v1483_v42  ;;  %v1456_v14 = vsub.f32 %v5095_v18, %v1438_v31  ;;  %v542_v31 = vld [vmem:[%s6100_s5 + $0x50] sm:$0xff] }
 0x3b0   : > { %v5483_v44 = vpop.eup %4443  ;;  %v1485_v13 = vmul.f32 1.442695, %v1456_v14  ;;  %1749 = vxpose.xlu0.b32.cont [5/16] %v1399_v15, 128  ;;  %v543_v14 = vld [vmem:[%s6100_s5 + $0x58] sm:$0xff] }
 0x3b1   : > { %1511 = vadd.xlane.f32.xlu1 %v5483_v44  ;;  %v1440_v63 = vpop.xlane.xlu1 %1439 }
 0x3b2   : > { %4447 = vpow2.f32 %v1485_v13  ;;  %v1457_v20 = vsub.f32 %v5109_v24, %v1440_v63  ;;  %v5585_v13 = vpack.c.bf16 %v543_v14, %v542_v31  ;;  %v544_v63 = vld [vmem:[%s6100_s5 + $0x60] sm:$0xff] }
 0x3b4   : > { %v1487_v3 = vmul.f32 1.442695, %v1457_v20  ;;  %1750 = vxpose.xlu0.b32.cont [6/16] %v5412_v62, 128  ;;  %v545_v20 = vld [vmem:[%s6100_s5 + $0x68] sm:$0xff] }
 0x3b5   : > { %v1442_v5 = vpop.xlane.xlu1 %1441 }
 0x3b6   : > { %4449 = vpow2.f32 %v1487_v3  ;;  %v1458_v12 = vsub.f32 %v5105_v22, %v1442_v5  ;;  %v5595_v5 = vpack.c.bf16 %v545_v20, %v544_v63 }
 0x3b8   : > { %v5489_v39 = vpop.eup %4445  ;;  %v1489_v18 = vmul.f32 1.442695, %v1458_v12  ;;  %1751 = vxpose.xlu0.b32.cont [7/16] %v5423_v9, 128  ;;  %v533_v9 = vld [vmem:[%s6100_s5 + $0x8] sm:$0xff] }
 0x3b9   : > { %1515 = vadd.xlane.f32.xlu1 %v5489_v39 }
 0x3ba   : > { %4451 = vpow2.f32 %v1489_v18  ;;  %v546_v18 = vld [vmem:[%s6100_s5 + $0x70] sm:$0xff] }
 0x3bb   : > { %4453 = vpow2.f32 %v1481_v50  ;;  %v547_v50 = vld [vmem:[%s6100_s5 + $0x78] sm:$0xff] }
 0x3bc   : > { %v5493_v58 = vpop.eup %4447  ;;  %1752 = vxpose.xlu0.b32.cont [8/16] %v5426_v34, 128 }
 0x3bd   : > { %1517 = vadd.xlane.f32.xlu1 %v5493_v58 }
 0x3c0   : > { %v5497_v24 = vpop.eup %4449  ;;  %1753 = vxpose.xlu0.b32.cont [9/16] %v5429_v8, 128 }
 0x3c1   : > { %1519 = vadd.xlane.f32.xlu1 %v5497_v24 }
 0x3c4   : > { %v5501_v22 = vpop.eup %4451  ;;  %1754 = vxpose.xlu0.b32.cont [10/16] %v5438_v55, 128  ;;  %v534_v55 = vld [vmem:[%s6100_s5 + $0x10] sm:$0xff] }
 0x3c5   : > { %1521 = vadd.xlane.f32.xlu1 %v5501_v22  ;;  %v5508_v23 = vpop.eup %4453 }
 0x3c8   : > { %1755 = vxpose.xlu0.b32.cont [11/16] %v5441_v56, 128  ;;  %v535_v56 = vld [vmem:[%s6100_s5 + $0x18] sm:$0xff] }
 0x3cc   : > { %1756 = vxpose.xlu0.b32.cont [12/16] %v5444_v61, 128  ;;  %v5545_v61 = vpack.c.bf16 %v535_v56, %v534_v55 }
 0x3d0   : > { %1757 = vxpose.xlu0.b32.cont [13/16] %v5447_v37, 128 }
 0x3d4   : > { %1758 = vxpose.xlu0.b32.cont [14/16] %v1408_v27, 128  ;;  %v537_v27 = vld [vmem:[%s6100_s5 + $0x28] sm:$0xff] }
 0x3d8   : > { %1759 = vxpose.xlu0.b32.cont [15/16] %v1409_v36, 128  ;;  %v5555_v36 = vpack.c.bf16 %v537_v27, %v536_v54 }
 0x3dc   : > { %1760 = vxpose.xlu0.b32.end [16/16] %v1410_v16, 128  ;;  %v538_v16 = vld [vmem:[%s6100_s5 + $0x30] sm:$0xff] }
 0x3dd   : > { %v5565_v26 = vpack.c.bf16 %v539_v59, %v538_v16 }
 0x409   : > { %1513 = vadd.xlane.f32.xlu0 %v5508_v23 }
 0x420   : > { %v1761_v4 = vpop.trf.xlu0 }
 0x421   : > { %3711 = vmatprep.mubr.f32.mxu1 %v1761_v4  ;;  %v5605_v4 = vpack.c.bf16 %v547_v50, %v546_v18 }
 0x424   : > { %v1762_v0 = vpop.trf.xlu0 }
 0x425   : > { %3712 = vmatmul.mubr.f32.vlgmr.msra.gmra.mrb[32].mxu1 %v1762_v0 }
 0x426   : > { %4218 = vmatpush3.bf16.msra.mxu1 %v5120_v29 }
 0x427   : > { %4220 = vmatprep.subr.bf16.mxu1 %v5130_v35 }
 0x428   : > { %v1763_v28 = vpop.trf.xlu0 }
 0x429   : > { %3714 = vmatprep.mubr.f32.mxu1 %v1763_v28 }
 0x42a   : > { %4222 = vmatpush3.bf16.msra.mxu1 %v5130_v35 }
 0x42b   : > { %4224 = vmatprep.subr.bf16.mxu1 %v5140_v41 }
 0x42c   : > { %v1764_v11 = vpop.trf.xlu0 }
 0x42d   : > { %3715 = vmatmul.mubr.f32.gmra.mrb[34].mxu1 %v1764_v11 }
 0x42e   : > { %4226 = vmatpush3.bf16.msra.mxu1 %v5140_v41 }
 0x42f   : > { %4228 = vmatprep.subr.bf16.mxu1 %v5150_v47 }
 0x430   : > { %v1765_v1 = vpop.trf.xlu0 }
 0x431   : > { %3717 = vmatprep.mubr.f32.mxu1 %v1765_v1 }
 0x432   : > { %4230 = vmatpush3.bf16.msra.mxu1 %v5150_v47 }
 0x433   : > { %4232 = vmatprep.subr.bf16.mxu1 %v5160_v53 }
 0x434   : > { %v1766_v29 = vpop.trf.xlu0 }
 0x435   : > { %3718 = vmatmul.mubr.f32.gmra.mrb[36].mxu1 %v1766_v29 }
 0x436   : > { %4234 = vmatpush3.bf16.msra.mxu1 %v5160_v53  ;;  %v5526_v53 = vpop.xlane.xlu1 %1491 }
 0x437   : > { %4236 = vmatprep.subr.bf16.mxu1 %v5170_v25 }
 0x438   : > { %v1767_v35 = vpop.trf.xlu0 }
 0x439   : > { %3720 = vmatprep.mubr.f32.mxu1 %v1767_v35 }
 0x43a   : > { %4238 = vmatpush3.bf16.msra.mxu1 %v5170_v25  ;;  %v1494_v25 = vpop.xlane.xlu1 %1493 }
 0x43b   : > { %4240 = vmatprep.subr.bf16.mxu1 %v5180_v33  ;;  %4455 = vrcp.f32 %v1494_v25 }
 0x43c   : > { %v1768_v41 = vpop.trf.xlu0  ;;  %4457 = vrcp.f32 %v5526_v53 }
 0x43d   : > { %3721 = vmatmul.mubr.f32.gmra.mrb[38].mxu1 %v1768_v41 }
 0x43e   : > { %4242 = vmatpush3.bf16.msra.mxu1 %v5180_v33  ;;  %v1496_v62 = vpop.xlane.xlu1 %1495 }
 0x43f   : > { %4244 = vmatprep.subr.bf16.mxu1 %v5190_v43  ;;  %4459 = vrcp.f32 %v1496_v62 }
 0x440   : > { %v1769_v47 = vpop.trf.xlu0 }
 0x441   : > { %3723 = vmatprep.mubr.f32.mxu1 %v1769_v47 }
 0x442   : > { %4246 = vmatpush3.bf16.msra.mxu1 %v5190_v43  ;;  %v532_v43 = vld [vmem:[%s6100_s5] sm:$0xff]  ;;  %v1498_v34 = vpop.xlane.xlu1 %1497 }
 0x443   : > { %v5534_v8 = vpack.c.bf16 %v533_v9, %v532_v43  ;;  %4461 = vrcp.f32 %v1498_v34 }
 0x444   : > { %v1770_v45 = vpop.trf.xlu0 }
 0x445   : > { %3724 = vmatmul.mubr.f32.gmra.mrb[40].mxu1 %v1770_v45  ;;  %4184 = vmatprep.subr.bf16.mxu0 %v5534_v8  ;;  %v4456_v1 = vpop.eup %4455 }
 0x446   : > { %4280 = vmatprep.subr.bf16.mxu1 %v5534_v8  ;;  %4186 = vmatpush3.bf16.msra.mxu0 %v5534_v8  ;;  %v1500_v37 = vpop.xlane.xlu1 %1499  ;;  %v4458_v29 = vpop.eup %4457  ;;  %v5611_v41 = vmul.f32 %v4456_v1, %v5373_v57 }
 0x447   : > { %4188 = vmatprep.subr.bf16.mxu0 %v5545_v61  ;;  %4463 = vrcp.f32 %v1500_v37 }
 0x448   : > { %v1771_v2 = vpop.trf.xlu0 }
 0x449   : > { %3726 = vmatprep.mubr.f32.mxu1 %v1771_v2  ;;  %v4460_v35 = vpop.eup %4459  ;;  %v1524_v2 = vmul.f32 %v4458_v29, %v5367_v60 }
 0x44a   : > { %4190 = vmatpush3.bf16.msra.mxu0 %v5545_v61  ;;  %v1502_v46 = vpop.xlane.xlu1 %1501  ;;  %v5614_v45 = vmul.f32 %v4460_v35, %v5379_v52 }
 0x44b   : > { %4192 = vmatprep.subr.bf16.mxu0 %v5555_v36  ;;  %4465 = vrcp.f32 %v1502_v46 }
 0x44c   : > { %v1772_v51 = vpop.trf.xlu0 }
 0x44d   : > { %3727 = vmatmul.mubr.f32.gmra.mrb[42].mxu1 %v1772_v51  ;;  %v4462_v47 = vpop.eup %4461 }
 0x44e   : > { %4194 = vmatpush3.bf16.msra.mxu0 %v5555_v36  ;;  %v1504_v42 = vpop.xlane.xlu1 %1503  ;;  %v1530_v25 = vmul.f32 %v4462_v47, %v5385_v10 }
 0x44f   : > { %4196 = vmatprep.subr.bf16.mxu0 %v5565_v26  ;;  %4467 = vrcp.f32 %v1504_v42 }
 0x450   : > { %v1773_v15 = vpop.trf.xlu0 }
 0x451   : > { %3729 = vmatprep.mubr.f32.mxu1 %v1773_v15  ;;  %v4464_v51 = vpop.eup %4463  ;;  %v1555_v15 = vadd.f32 %v5611_v41, %v1524_v2 }
 0x452   : > { %4198 = vmatpush3.bf16.msra.mxu0 %v5565_v26  ;;  %v1506_v3 = vpop.xlane.xlu1 %1505 }
 0x453   : > { %4200 = vmatprep.subr.bf16.mxu0 %v5575_v7  ;;  %4469 = vrcp.f32 %v1506_v3  ;;  %v1556_v57 = vadd.f32 %v1555_v15, %v5614_v45 }
 0x454   : > { %v1774_v6 = vpop.trf.xlu0 }
 0x455   : > { %3730 = vmatmul.mubr.f32.gmra.mrb[44].mxu1 %v1774_v6  ;;  %v4466_v62 = vpop.eup %4465  ;;  %v1532_v6 = vmul.f32 %v4464_v51, %v5393_v19  ;;  %v1557_v9 = vadd.f32 %v1556_v57, %v1530_v25 }
 0x456   : > { %4202 = vmatpush3.bf16.msra.mxu0 %v5575_v7  ;;  %v1508_v12 = vpop.xlane.xlu1 %1507  ;;  %v1534_v43 = vmul.f32 %v4466_v62, %v5400_v17 }
 0x457   : > { %4204 = vmatprep.subr.bf16.mxu0 %v5585_v13  ;;  %4471 = vrcp.f32 %v1508_v12  ;;  %v1558_v55 = vadd.f32 %v1557_v9, %v1532_v6 }
 0x458   : > { %v1775_v33 = vpop.trf.xlu0 }
 0x459   : > { %3732 = vmatprep.mubr.f32.mxu1 %v1775_v33  ;;  %v4468_v33 = vpop.eup %4467  ;;  %v1559_v37 = vadd.f32 %v1558_v55, %v1534_v43  ;;  %v5655_v55 = vld [vmem:[%s4774_s23] sm:$0xff] }
 0x45a   : > { %4206 = vmatpush3.bf16.msra.mxu0 %v5585_v13  ;;  %v1510_v0 = vpop.xlane.xlu1 %1509  ;;  %v1536_v60 = vmul.f32 %v4468_v33, %v5414_v40 }
 0x45b   : > { %4208 = vmatprep.subr.bf16.mxu0 %v5595_v5  ;;  %4473 = vrcp.f32 %v1510_v0 }
 0x45c   : > { %v1776_v38 = vpop.trf.xlu0  ;;  %v1560_v16 = vadd.f32 %v1559_v37, %v1536_v60 }
 0x45d   : > { %3733 = vmatmul.mubr.f32.gmra.mrb[46].mxu1 %v1776_v38  ;;  %v4470_v34 = vpop.eup %4469 }
 0x45e   : > { %4210 = vmatpush3.bf16.msra.mxu0 %v5595_v5  ;;  %v1512_v28 = vpop.xlane.xlu1 %1511  ;;  %v1538_v56 = vmul.f32 %v4470_v34, %v5467_v48 }
 0x45f   : > { %4212 = vmatprep.subr.bf16.mxu0 %v5605_v4  ;;  %4475 = vrcp.f32 %v1512_v28 }
 0x460   : > { %v1561_v46 = vadd.f32 %v1560_v16, %v1538_v56 }
 0x461   : > { %v4472_v10 = vpop.eup %4471 }
 0x462   : > { %4214 = vmatpush3.bf16.msra.mxu0 %v5605_v4  ;;  %v1516_v11 = vpop.xlane.xlu1 %1515  ;;  %v1540_v19 = vmul.f32 %v4472_v10, %v5475_v30 }
 0x463   : > { %4477 = vrcp.f32 %v1516_v11 }
 0x464   : > { %v1562_v49 = vadd.f32 %v1561_v46, %v1540_v19 }
 0x465   : > { %v4474_v54 = vpop.eup %4473 }
 0x466   : > { %v1518_v53 = vpop.xlane.xlu1 %1517  ;;  %v1542_v59 = vmul.f32 %v4474_v54, %v5479_v21 }
 0x468   : > { %v1563_v42 = vadd.f32 %v1562_v49, %v1542_v59  ;;  %v5671_v49 = vld [vmem:[%s4774_s23 + $0x20] sm:$0xff] }
 0x469   : > { %v4476_v17 = vpop.eup %4475 }
 0x46a   : > { %v1520_v52 = vpop.xlane.xlu1 %1519  ;;  %v1544_v40 = vmul.f32 %v4476_v17, %v5483_v44  ;;  %v5667_v17 = vld [vmem:[%s4774_s23 + $0x18] sm:$0xff] }
 0x46c   : > { %v1564_v14 = vadd.f32 %v1563_v42, %v1544_v40  ;;  %v5675_v42 = vld [vmem:[%s4774_s23 + $0x28] sm:$0xff] }
 0x46d   : > { %v4478_v32 = vpop.eup %4477 }
 0x46e   : > { %v1522_v27 = vpop.xlane.xlu1 %1521  ;;  %v1548_v30 = vmul.f32 %v4478_v32, %v5489_v39 }
 0x496   : > { %v1514_v38 = vpop.xlane.xlu0 %1513 }
 0x497   : > { %4479 = vrcp.f32 %v1514_v38 }
 0x498   : > { %4481 = vrcp.f32 %v1518_v53 }
 0x499   : > { %4483 = vrcp.f32 %v1520_v52 }
 0x49a   : > { %4485 = vrcp.f32 %v1522_v27  ;;  %v5663_v27 = vld [vmem:[%s4774_s23 + $0x10] sm:$0xff] }
 0x4a1   : > { %v4480_v31 = vpop.eup %4479 }
 0x4a2   : > { %v1546_v48 = vmul.f32 %v4480_v31, %v5508_v23  ;;  %v4482_v63 = vpop.eup %4481 }
 0x4a3   : > { %v4484_v3 = vpop.eup %4483  ;;  %v1550_v12 = vmul.f32 %v4482_v63, %v5493_v58  ;;  %v5679_v63 = vld [vmem:[%s4774_s23 + $0x30] sm:$0xff] }
 0x4a4   : > { %v1565_v20 = vadd.f32 %v1564_v14, %v1546_v48  ;;  %v4486_v21 = vpop.eup %4485  ;;  %v1552_v50 = vmul.f32 %v4484_v3, %v5497_v24 }
 0x4a5   : > { %v1554_v44 = vmul.f32 %v4486_v21, %v5501_v22  ;;  %v5687_v21 = vld [vmem:[%s4774_s23 + $0x40] sm:$0xff] }
 0x4a6   : > { %v1566_v18 = vadd.f32 %v1565_v20, %v1548_v30  ;;  %v5683_v20 = vld [vmem:[%s4774_s23 + $0x38] sm:$0xff] }
 0x4a8   : > { %v1567_v0 = vadd.f32 %v1566_v18, %v1550_v12 }
 0x4aa   : > { %v1568_v28 = vadd.f32 %v1567_v0, %v1552_v50  ;;  %v5691_v0 = vld [vmem:[%s4774_s23 + $0x48] sm:$0xff] }
 0x4ac   : > { %v1569_v11 = vadd.f32 %v1568_v28, %v1554_v44 }
 0x4ae   : > { %v1570_v1 = vrot.slane %v1569_v11, 4 }
 0x4b0   : > { %v1571_v29 = vadd.f32 %v1570_v1, %v1569_v11  ;;  %v5695_v1 = vld [vmem:[%s4774_s23 + $0x50] sm:$0xff] }
 0x4b2   : > { %v1572_v23 = vrot.slane %v1571_v29, 2 }
 0x4b4   : > { %v1573_v35 = vadd.f32 %v1572_v23, %v1571_v29  ;;  %v5699_v23 = vld [vmem:[%s4774_s23 + $0x58] sm:$0xff] }
 0x4b6   : > { %v1574_v47 = vrot.slane %v1573_v35, 1 }
 0x4b8   : > { %v1575_v39 = vadd.f32 %v1574_v47, %v1573_v35 }
 0x4ba   : > { %v1576_v53 = vadd.f32 1e-09, %v1575_v39 }
 0x4bc   : > { %4487 = vrcp.f32 %v1576_v53  ;;  %v5703_v53 = vld [vmem:[%s4774_s23 + $0x60] sm:$0xff] }
 0x4c6   : > { %v4488_v51 = vpop.eup %4487 }
 0x4c7   : > { %v1578_v58 = vmul.f32 %v4488_v51, %v1524_v2  ;;  %v1579_v15 = vmul.f32 %v4488_v51, %v5611_v41  ;;  %v1580_v24 = vmul.f32 %v4488_v51, %v5614_v45  ;;  %v1581_v62 = vmul.f32 %v4488_v51, %v1530_v25 }
 0x4c8   : > { %v1582_v57 = vmul.f32 %v4488_v51, %v1532_v6  ;;  %v1583_v22 = vmul.f32 %v4488_v51, %v1534_v43  ;;  %v1584_v33 = vmul.f32 %v4488_v51, %v1536_v60  ;;  %v1585_v52 = vmul.f32 %v4488_v51, %v1538_v56  ;;  %v5659_v56 = vld [vmem:[%s4774_s23 + $0x8] sm:$0xff] }
 0x4c9   : > { %2310 = vxpose.xlu1.b32.start [1/16] %v1578_v58, 128  ;;  %2760 = vst [vmem:[%s5636_s1] sm:$0xff] %v1578_v58  ;;  %2761 = vst [vmem:[%s5636_s1 + $0x8] sm:$0xff] %v1579_v15  ;;  %v1586_v41 = vmul.f32 %v4488_v51, %v1540_v19  ;;  %v1587_v45 = vmul.f32 %v4488_v51, %v1542_v59  ;;  %v1588_v2 = vmul.f32 %v4488_v51, %v1544_v40  ;;  %v5707_v58 = vld [vmem:[%s4774_s23 + $0x68] sm:$0xff] }
 0x4ca   : > { %2762 = vst [vmem:[%s5636_s1 + $0x10] sm:$0xff] %v1580_v24  ;;  %2763 = vst [vmem:[%s5636_s1 + $0x18] sm:$0xff] %v1581_v62  ;;  %v1589_v25 = vmul.f32 %v4488_v51, %v1546_v48  ;;  %v1590_v6 = vmul.f32 %v4488_v51, %v1548_v30  ;;  %v1591_v43 = vmul.f32 %v4488_v51, %v1550_v12 }
 0x4cb   : > { %2764 = vst [vmem:[%s5636_s1 + $0x20] sm:$0xff] %v1582_v57  ;;  %2765 = vst [vmem:[%s5636_s1 + $0x28] sm:$0xff] %v1583_v22  ;;  %v1592_v9 = vmul.f32 %v4488_v51, %v1552_v50  ;;  %v1593_v34 = vmul.f32 %v4488_v51, %v1554_v44 }
 0x4cc   : > { %2766 = vst [vmem:[%s5636_s1 + $0x30] sm:$0xff] %v1584_v33  ;;  %2767 = vst [vmem:[%s5636_s1 + $0x38] sm:$0xff] %v1585_v52 }
 0x4cd   : > { %2768 = vst [vmem:[%s5636_s1 + $0x40] sm:$0xff] %v1586_v41  ;;  %2769 = vst [vmem:[%s5636_s1 + $0x48] sm:$0xff] %v1587_v45  ;;  %2311 = vxpose.xlu1.b32.cont [2/16] %v1579_v15, 128 }
 0x4ce   : > { %2770 = vst [vmem:[%s5636_s1 + $0x50] sm:$0xff] %v1588_v2  ;;  %2771 = vst [vmem:[%s5636_s1 + $0x58] sm:$0xff] %v1589_v25 }
 0x4cf   : > { %2772 = vst [vmem:[%s5636_s1 + $0x60] sm:$0xff] %v1590_v6  ;;  %2773 = vst [vmem:[%s5636_s1 + $0x68] sm:$0xff] %v1591_v43 }
 0x4d0   : > { %2774 = vst [vmem:[%s5636_s1 + $0x70] sm:$0xff] %v1592_v9  ;;  %2775 = vst [vmem:[%s5636_s1 + $0x78] sm:$0xff] %v1593_v34 }
 0x4d1   : > { %2312 = vxpose.xlu1.b32.cont [3/16] %v1580_v24, 128 }
 0x4d5   : > { %2313 = vxpose.xlu1.b32.cont [4/16] %v1581_v62, 128 }
 0x4d9   : > { %2314 = vxpose.xlu1.b32.cont [5/16] %v1582_v57, 128  ;;  %v5711_v57 = vld [vmem:[%s4774_s23 + $0x70] sm:$0xff] }
 0x4dd   : > { %2315 = vxpose.xlu1.b32.cont [6/16] %v1583_v22, 128 }
 0x4e1   : > { %2316 = vxpose.xlu1.b32.cont [7/16] %v1584_v33, 128  ;;  %v5715_v33 = vld [vmem:[%s4774_s23 + $0x78] sm:$0xff] }
 0x4e5   : > { %2317 = vxpose.xlu1.b32.cont [8/16] %v1585_v52, 128 }
 0x4e9   : > { %2318 = vxpose.xlu1.b32.cont [9/16] %v1586_v41, 128  ;;  %v5721_v41 = vld [vmem:[%s6101_s6] ss:$0 sm:$0xff] }
 0x4ed   : > { %2319 = vxpose.xlu1.b32.cont [10/16] %v1587_v45, 128  ;;  %v5726_v45 = vld [vmem:[%s6102_s7] ss:$0 sm:$0xff] }
 0x4f1   : > { %2320 = vxpose.xlu1.b32.cont [11/16] %v1588_v2, 128 }
 0x4f5   : > { %2321 = vxpose.xlu1.b32.cont [12/16] %v1589_v25, 128 }
 0x4f8   : > { %v3713_v60 = vpop.f32.mrb[32].mxu1 }
 0x4f9   : > { %2322 = vxpose.xlu1.b32.cont [13/16] %v1590_v6, 128  ;;  %v1843_v38 = vpop.f32.mrb[33].mxu1  ;;  %v1923_v37 = vsub.f32 %v5659_v56, %v3713_v60 }
 0x4fa   : > { %v1922_v10 = vsub.f32 %v5655_v55, %v1843_v38 }
 0x4fc   : > { %3767 = vmatprep.mubr.f32.mxu0 %v1922_v10 }
 0x4fd   : > { %2323 = vxpose.xlu1.b32.cont [14/16] %v1591_v43, 128  ;;  %3768 = vmatmul.mubr.f32.vlgmr.msra.gmra.mrb[48].mxu0 %v1923_v37  ;;  %v5732_v43 = vld [vmem:[%s6103_s8] ss:$0 sm:$0xff] }
 0x500   : > { %v3716_v54 = vpop.f32.mrb[34].mxu1 }
 0x501   : > { %2324 = vxpose.xlu1.b32.cont [15/16] %v1592_v9, 128  ;;  %v1853_v19 = vpop.f32.mrb[35].mxu1  ;;  %v1925_v59 = vsub.f32 %v5667_v17, %v3716_v54 }
 0x502   : > { %v1924_v16 = vsub.f32 %v5663_v27, %v1853_v19 }
 0x504   : > { %3770 = vmatprep.mubr.f32.mxu0 %v1924_v16  ;;  %v4505_v16 = vld [vmem:[%s4761_s26 + $0x8] sm:$0xff] }
 0x505   : > { %2325 = vxpose.xlu1.b32.end [16/16] %v1593_v34, 128  ;;  %3771 = vmatmul.mubr.f32.gmra.mrb[50].mxu0 %v1925_v59 }
 0x508   : > { %v3719_v46 = vpop.f32.mrb[36].mxu1 }
 0x509   : > { %v1863_v40 = vpop.f32.mrb[37].mxu1  ;;  %v1927_v31 = vsub.f32 %v5675_v42, %v3719_v46 }
 0x50a   : > { %v1926_v32 = vsub.f32 %v5671_v49, %v1863_v40 }
 0x50c   : > { %3773 = vmatprep.mubr.f32.mxu0 %v1926_v32 }
 0x50d   : > { %3774 = vmatmul.mubr.f32.gmra.mrb[52].mxu0 %v1927_v31  ;;  %v4506_v31 = vld [vmem:[%s4761_s26] sm:$0xff] }
 0x510   : > { %v3722_v48 = vpop.f32.mrb[38].mxu1 }
 0x511   : > { %v1873_v14 = vpop.f32.mrb[39].mxu1  ;;  %v1929_v3 = vsub.f32 %v5683_v20, %v3722_v48 }
 0x512   : > { %v1928_v30 = vsub.f32 %v5679_v63, %v1873_v14 }
 0x514   : > { %3776 = vmatprep.mubr.f32.mxu0 %v1928_v30 }
 0x515   : > { %3777 = vmatmul.mubr.f32.gmra.mrb[54].mxu0 %v1929_v3 }
 0x518   : > { %v3725_v12 = vpop.f32.mrb[40].mxu1 }
 0x519   : > { %v1883_v18 = vpop.f32.mrb[41].mxu1  ;;  %v1931_v44 = vsub.f32 %v5691_v0, %v3725_v12 }
 0x51a   : > { %v1930_v50 = vsub.f32 %v5687_v21, %v1883_v18 }
 0x51c   : > { %3779 = vmatprep.mubr.f32.mxu0 %v1930_v50 }
 0x51d   : > { %3780 = vmatmul.mubr.f32.gmra.mrb[56].mxu0 %v1931_v44 }
 0x520   : > { %v3728_v28 = vpop.f32.mrb[42].mxu1 }
 0x521   : > { %v1893_v11 = vpop.f32.mrb[43].mxu1  ;;  %v1933_v35 = vsub.f32 %v5699_v23, %v3728_v28 }
 0x522   : > { %v1932_v29 = vsub.f32 %v5695_v1, %v1893_v11 }
 0x524   : > { %3782 = vmatprep.mubr.f32.mxu0 %v1932_v29  ;;  %v4507_v29 = vld [vmem:[%s4761_s26 + $0x18] sm:$0xff] }
 0x525   : > { %3783 = vmatmul.mubr.f32.gmra.mrb[58].mxu0 %v1933_v35 }
 0x528   : > { %v3731_v47 = vpop.f32.mrb[44].mxu1 }
 0x529   : > { %v1903_v39 = vpop.f32.mrb[45].mxu1  ;;  %v1935_v15 = vsub.f32 %v5707_v58, %v3731_v47 }
 0x52a   : > { %v1934_v51 = vsub.f32 %v5703_v53, %v1903_v39  ;;  %v4508_v39 = vld [vmem:[%s4761_s26 + $0x10] sm:$0xff] }
 0x52c   : > { %3785 = vmatprep.mubr.f32.mxu0 %v1934_v51 }
 0x52d   : > { %3786 = vmatmul.mubr.f32.gmra.mrb[60].mxu0 %v1935_v15 }
 0x530   : > { %v3734_v24 = vpop.f32.mrb[46].mxu1 }
 0x531   : > { %v1913_v62 = vpop.f32.mrb[47].mxu1  ;;  %v1937_v52 = vsub.f32 %v5715_v33, %v3734_v24 }
 0x532   : > { %v1936_v22 = vsub.f32 %v5711_v57, %v1913_v62 }
 0x534   : > { %3788 = vmatprep.mubr.f32.mxu0 %v1936_v22 }
 0x535   : > { %3789 = vmatmul.mubr.f32.gmra.mrb[62].mxu0 %v1937_v52 }
 0x5d0   : > { %v3769_v2 = vpop.f32.mrb[48].mxu0 }
 0x5d1   : > { %v2016_v25 = vadd.f32 %v3769_v2, %v5721_v41  ;;  %v2010_v6 = vpop.f32.mrb[49].mxu0 }
 0x5d2   : > { %v2011_v9 = vadd.f32 %v5721_v41, %v2010_v6  ;;  %v4509_v6 = vld [vmem:[%s4761_s26 + $0x28] sm:$0xff] }
 0x5d3   : > { %v2096_v34 = vmul.f32 %v5726_v45, %v2016_v25 }
 0x5d4   : > { %v2095_v60 = vmul.f32 %v5726_v45, %v2011_v9 }
 0x5d5   : > { %v2118_v38 = vadd.f32 %v5732_v43, %v2096_v34 }
 0x5d6   : > { %v2117_v10 = vadd.f32 %v5732_v43, %v2095_v60  ;;  %v4510_v60 = vld [vmem:[%s4761_s26 + $0x20] sm:$0xff] }
 0x5d7   : > { %v2134_v37 = vmax.f32 %v2118_v38, 0.0 }
 0x5d8   : > { %v2133_v54 = vmax.f32 %v2117_v10, 0.0  ;;  %v3772_v19 = vpop.f32.mrb[50].mxu0 }
 0x5d9   : > { %v5746_v59 = vadd.f32 %v4505_v16, %v2134_v37  ;;  %v2026_v46 = vadd.f32 %v3772_v19, %v5721_v41  ;;  %v2020_v40 = vpop.f32.mrb[51].mxu0 }
 0x5da   : > { %v2021_v32 = vadd.f32 %v5721_v41, %v2020_v40  ;;  %v5751_v48 = vadd.f32 %v4506_v31, %v2133_v54 }
 0x5db   : > { %2713 = vst [vmem:[%s5743_s17 + $0x8] sm:$0xff] %v5746_v59  ;;  %v2098_v14 = vmul.f32 %v5726_v45, %v2026_v46 }
 0x5dc   : > { %v2097_v30 = vmul.f32 %v5726_v45, %v2021_v32  ;;  %3823 = vmatprep.mubr.f32.mxu1 %v5751_v48  ;;  %2712 = vst [vmem:[%s5743_s17] sm:$0xff] %v5751_v48  ;;  %v4511_v32 = vld [vmem:[%s4761_s26 + $0x38] sm:$0xff] }
 0x5dd   : > { %v2120_v3 = vadd.f32 %v5732_v43, %v2098_v14  ;;  %3824 = vmatmul.mubr.f32.vlgmr.msra.gmra.mrb[48].mxu1 %v5746_v59 }
 0x5de   : > { %v2119_v12 = vadd.f32 %v5732_v43, %v2097_v30  ;;  %4282 = vmatpush3.bf16.msra.mxu1 %v5534_v8  ;;  %v4512_v30 = vld [vmem:[%s4761_s26 + $0x30] sm:$0xff] }
 0x5df   : > { %v2136_v18 = vmax.f32 %v2120_v3, 0.0  ;;  %4284 = vmatprep.subr.bf16.mxu1 %v5545_v61 }
 0x5e0   : > { %v2135_v50 = vmax.f32 %v2119_v12, 0.0  ;;  %v3775_v44 = vpop.f32.mrb[52].mxu0 }
 0x5e1   : > { %v2036_v28 = vadd.f32 %v3775_v44, %v5721_v41  ;;  %v2030_v11 = vpop.f32.mrb[53].mxu0  ;;  %v5767_v35 = vadd.f32 %v4507_v29, %v2136_v18 }
 0x5e2   : > { %v2031_v47 = vadd.f32 %v5721_v41, %v2030_v11  ;;  %v5771_v51 = vadd.f32 %v4508_v39, %v2135_v50  ;;  %4286 = vmatpush3.bf16.msra.mxu1 %v5545_v61 }
 0x5e3   : > { %v2100_v8 = vmul.f32 %v5726_v45, %v2036_v28  ;;  %2715 = vst [vmem:[%s5743_s17 + $0x18] sm:$0xff] %v5767_v35  ;;  %4288 = vmatprep.subr.bf16.mxu1 %v5555_v36 }
 0x5e4   : > { %v2099_v15 = vmul.f32 %v5726_v45, %v2031_v47  ;;  %3826 = vmatprep.mubr.f32.mxu1 %v5771_v51  ;;  %2714 = vst [vmem:[%s5743_s17 + $0x10] sm:$0xff] %v5771_v51  ;;  %v4513_v47 = vld [vmem:[%s4761_s26 + $0x48] sm:$0xff] }
 0x5e5   : > { %v2122_v24 = vadd.f32 %v5732_v43, %v2100_v8  ;;  %3827 = vmatmul.mubr.f32.gmra.mrb[50].mxu1 %v5767_v35 }
 0x5e6   : > { %v2121_v61 = vadd.f32 %v5732_v43, %v2099_v15  ;;  %4290 = vmatpush3.bf16.msra.mxu1 %v5555_v36  ;;  %v4514_v15 = vld [vmem:[%s4761_s26 + $0x40] sm:$0xff] }
 0x5e7   : > { %v2138_v62 = vmax.f32 %v2122_v24, 0.0  ;;  %4292 = vmatprep.subr.bf16.mxu1 %v5565_v26 }
 0x5e8   : > { %v2137_v22 = vmax.f32 %v2121_v61, 0.0  ;;  %v3778_v52 = vpop.f32.mrb[54].mxu0 }
 0x5e9   : > { %v2046_v2 = vadd.f32 %v3778_v52, %v5721_v41  ;;  %v2040_v25 = vpop.f32.mrb[55].mxu0  ;;  %v5789_v9 = vadd.f32 %v4509_v6, %v2138_v62 }
 0x5ea   : > { %v2041_v34 = vadd.f32 %v5721_v41, %v2040_v25  ;;  %v5793_v38 = vadd.f32 %v4510_v60, %v2137_v22  ;;  %4294 = vmatpush3.bf16.msra.mxu1 %v5565_v26 }
 0x5eb   : > { %v2102_v36 = vmul.f32 %v5726_v45, %v2046_v2  ;;  %2717 = vst [vmem:[%s5743_s17 + $0x28] sm:$0xff] %v5789_v9  ;;  %4296 = vmatprep.subr.bf16.mxu1 %v5575_v7 }
 0x5ec   : > { %v2101_v10 = vmul.f32 %v5726_v45, %v2041_v34  ;;  %3829 = vmatprep.mubr.f32.mxu1 %v5793_v38  ;;  %2716 = vst [vmem:[%s5743_s17 + $0x20] sm:$0xff] %v5793_v38  ;;  %v4515_v34 = vld [vmem:[%s4761_s26 + $0x58] sm:$0xff] }
 0x5ed   : > { %v2124_v37 = vadd.f32 %v5732_v43, %v2102_v36  ;;  %3830 = vmatmul.mubr.f32.gmra.mrb[52].mxu1 %v5789_v9 }
 0x5ee   : > { %v2123_v26 = vadd.f32 %v5732_v43, %v2101_v10  ;;  %4298 = vmatpush3.bf16.msra.mxu1 %v5575_v7  ;;  %v4516_v10 = vld [vmem:[%s4761_s26 + $0x50] sm:$0xff] }
 0x5ef   : > { %v2140_v54 = vmax.f32 %v2124_v37, 0.0  ;;  %4300 = vmatprep.subr.bf16.mxu1 %v5585_v13 }
 0x5f0   : > { %v2139_v19 = vmax.f32 %v2123_v26, 0.0  ;;  %v3781_v16 = vpop.f32.mrb[56].mxu0 }
 0x5f1   : > { %v2056_v46 = vadd.f32 %v3781_v16, %v5721_v41  ;;  %v2050_v40 = vpop.f32.mrb[57].mxu0  ;;  %v5811_v31 = vadd.f32 %v4511_v32, %v2140_v54 }
 0x5f2   : > { %v2051_v14 = vadd.f32 %v5721_v41, %v2050_v40  ;;  %v5815_v3 = vadd.f32 %v4512_v30, %v2139_v19  ;;  %4302 = vmatpush3.bf16.msra.mxu1 %v5585_v13 }
 0x5f3   : > { %v2104_v7 = vmul.f32 %v5726_v45, %v2056_v46  ;;  %2719 = vst [vmem:[%s5743_s17 + $0x38] sm:$0xff] %v5811_v31  ;;  %4304 = vmatprep.subr.bf16.mxu1 %v5595_v5 }
 0x5f4   : > { %v2103_v12 = vmul.f32 %v5726_v45, %v2051_v14  ;;  %3832 = vmatprep.mubr.f32.mxu1 %v5815_v3  ;;  %2718 = vst [vmem:[%s5743_s17 + $0x30] sm:$0xff] %v5815_v3 }
 0x5f5   : > { %v2126_v18 = vadd.f32 %v5732_v43, %v2104_v7  ;;  %3833 = vmatmul.mubr.f32.gmra.mrb[54].mxu1 %v5811_v31  ;;  %v4517_v7 = vld [vmem:[%s4761_s26 + $0x68] sm:$0xff] }
 0x5f6   : > { %v2125_v13 = vadd.f32 %v5732_v43, %v2103_v12  ;;  %4306 = vmatpush3.bf16.msra.mxu1 %v5595_v5 }
 0x5f7   : > { %v2142_v50 = vmax.f32 %v2126_v18, 0.0  ;;  %4308 = vmatprep.subr.bf16.mxu1 %v5605_v4 }
 0x5f8   : > { %v2141_v44 = vmax.f32 %v2125_v13, 0.0  ;;  %v3784_v28 = vpop.f32.mrb[58].mxu0  ;;  %v4518_v13 = vld [vmem:[%s4761_s26 + $0x60] sm:$0xff] }
 0x5f9   : > { %v2066_v11 = vadd.f32 %v3784_v28, %v5721_v41  ;;  %v2060_v29 = vpop.f32.mrb[59].mxu0  ;;  %v5833_v39 = vadd.f32 %v4513_v47, %v2142_v50 }
 0x5fa   : > { %v2061_v8 = vadd.f32 %v5721_v41, %v2060_v29  ;;  %v5837_v24 = vadd.f32 %v4514_v15, %v2141_v44  ;;  %4310 = vmatpush3.bf16.msra.mxu1 %v5605_v4  ;;  %v4519_v15 = vld [vmem:[%s4761_s26 + $0x78] sm:$0xff] }
 0x5fb   : > { %v2106_v5 = vmul.f32 %v5726_v45, %v2066_v11  ;;  %2721 = vst [vmem:[%s5743_s17 + $0x48] sm:$0xff] %v5833_v39 }
 0x5fc   : > { %v2105_v61 = vmul.f32 %v5726_v45, %v2061_v8  ;;  %3835 = vmatprep.mubr.f32.mxu1 %v5837_v24  ;;  %2720 = vst [vmem:[%s5743_s17 + $0x40] sm:$0xff] %v5837_v24 }
 0x5fd   : > { %v2128_v62 = vadd.f32 %v5732_v43, %v2106_v5  ;;  %3836 = vmatmul.mubr.f32.gmra.mrb[56].mxu1 %v5833_v39 }
 0x5fe   : > { %v2127_v22 = vadd.f32 %v5732_v43, %v2105_v61  ;;  %v4520_v61 = vld [vmem:[%s4761_s26 + $0x70] sm:$0xff]  ;;  %s6110_s26 = sshll.u32 %s4708_s25, 11 }
 0x5ff   : > { %v2144_v4 = vmax.f32 %v2128_v62, 0.0  ;;  %s5924_s16 = scalar_lea.hbm %s6106_s11, %s6110_s26 }
 0x600   : > { %v2143_v52 = vmax.f32 %v2127_v22, 0.0  ;;  %v3787_v2 = vpop.f32.mrb[60].mxu0  ;;  %v2326_v22 = vpop.trf.xlu1 }
 0x601   : > { %v2076_v25 = vadd.f32 %v3787_v2, %v5721_v41  ;;  %v2070_v6 = vpop.f32.mrb[61].mxu0  ;;  %v5852_v60 = vadd.f32 %v4515_v34, %v2144_v4  ;;  %3879 = vmatprep.mubr.f32.mxu0 %v2326_v22 }
 0x602   : > { %v2071_v36 = vadd.f32 %v5721_v41, %v2070_v6  ;;  %v5856_v37 = vadd.f32 %v4516_v10, %v2143_v52  ;;  %v4521_v52 = vld [vmem:[%s6126_s4] ss:$0 sm:$0xff] }
 0x603   : > { %v2108_v26 = vmul.f32 %v5726_v45, %v2076_v25  ;;  %2723 = vst [vmem:[%s5743_s17 + $0x58] sm:$0xff] %v5852_v60 }
 0x604   : > { %v2107_v54 = vmul.f32 %v5726_v45, %v2071_v36  ;;  %3838 = vmatprep.mubr.f32.mxu1 %v5856_v37  ;;  %2722 = vst [vmem:[%s5743_s17 + $0x50] sm:$0xff] %v5856_v37  ;;  %v2327_v36 = vpop.trf.xlu1 }
 0x605   : > { %v2130_v19 = vadd.f32 %v5732_v43, %v2108_v26  ;;  %3839 = vmatmul.mubr.f32.gmra.mrb[58].mxu1 %v5852_v60 }
 0x606   : > { %v2129_v16 = vadd.f32 %v5732_v43, %v2107_v54 }
 0x607   : > { %v2146_v46 = vmax.f32 %v2130_v19, 0.0 }
 0x608   : > { %v2145_v40 = vmax.f32 %v2129_v16, 0.0  ;;  %v3790_v32 = vpop.f32.mrb[62].mxu0 }
 0x609   : > { %v2086_v14 = vadd.f32 %v3790_v32, %v5721_v41  ;;  %v2080_v30 = vpop.f32.mrb[63].mxu0  ;;  %v5870_v12 = vadd.f32 %v4517_v7, %v2146_v46  ;;  %v2328_v46 = vpop.trf.xlu1 }
 0x60a   : > { %v2081_v18 = vadd.f32 %v5721_v41, %v2080_v30  ;;  %v5874_v50 = vadd.f32 %v4518_v13, %v2145_v40 }
 0x60b   : > { %v2110_v44 = vmul.f32 %v5726_v45, %v2086_v14  ;;  %2725 = vst [vmem:[%s5743_s17 + $0x68] sm:$0xff] %v5870_v12 }
 0x60c   : > { %v2109_v28 = vmul.f32 %v5726_v45, %v2081_v18  ;;  %3841 = vmatprep.mubr.f32.mxu1 %v5874_v50  ;;  %2724 = vst [vmem:[%s5743_s17 + $0x60] sm:$0xff] %v5874_v50 }
 0x60d   : > { %v2132_v11 = vadd.f32 %v5732_v43, %v2110_v44  ;;  %3842 = vmatmul.mubr.f32.gmra.mrb[60].mxu1 %v5870_v12  ;;  %v2329_v7 = vpop.trf.xlu1 }
 0x60e   : > { %v2131_v29 = vadd.f32 %v5732_v43, %v2109_v28 }
 0x60f   : > { %v2148_v47 = vmax.f32 %v2132_v11, 0.0 }
 0x610   : > { %v2147_v8 = vmax.f32 %v2131_v29, 0.0 }
 0x611   : > { %v5887_v5 = vadd.f32 %v4519_v15, %v2148_v47  ;;  %v2330_v11 = vpop.trf.xlu1 }
 0x612   : > { %v5890_v62 = vadd.f32 %v4520_v61, %v2147_v8 }
 0x613   : > { %2727 = vst [vmem:[%s5743_s17 + $0x78] sm:$0xff] %v5887_v5 }
 0x614   : > { %3844 = vmatprep.mubr.f32.mxu1 %v5890_v62  ;;  %2726 = vst [vmem:[%s5743_s17 + $0x70] sm:$0xff] %v5890_v62  ;;  %s4522_s17 = scalar_lea.vmem %s5926_s20, 2048 }
 0x615   : > { %3845 = vmatmul.mubr.f32.gmra.mrb[62].mxu1 %v5887_v5  ;;  %v2331_v8 = vpop.trf.xlu1  ;;  %p4523_p11 = scmp.ne.s32.totalorder %s5926_s20, %s4522_s17  ;;  %p4530_p1 = scmp.lt.s32.totalorder %s4528_s29, %s4522_s17 }
 0x617   : > { %p4524_p12 = pnand %p4523_p11, %p4725_p5  ;;  %p4531_p2 = por %p4530_p1, %p4529_p0 }
 0x619   : > { %p4525_p13 = pneg %p4524_p12 }
 0x61b   : > { %p4532_p3 = pnand %p4531_p2, %p4525_p13 }
 0x6b0   : > { %v3825_v4 = vpop.f32.mrb[48].mxu1 }
 0x6b1   : > { %v2237_v2 = vadd.f32 %v4521_v52, %v3825_v4  ;;  %v2231_v25 = vpop.f32.mrb[49].mxu1 }
 0x6b2   : > { %v2232_v6 = vadd.f32 %v4521_v52, %v2231_v25  ;;  %v2332_v25 = vpop.trf.xlu1 }
 0x6b4   : > { %v4247_v34 = vpack.c.bf16 %v2237_v2, %v2232_v6 }
 0x6b6   : > { %4248 = vmatprep.subr.bf16.mxu0 %v4247_v34 }
 0x6b7   : > { %4250 = vmatpush3.bf16.msra.mxu0 %v4247_v34 }
 0x6b8   : > { %v3828_v10 = vpop.f32.mrb[50].mxu1 }
 0x6b9   : > { %v2247_v26 = vadd.f32 %v4521_v52, %v3828_v10  ;;  %v2241_v54 = vpop.f32.mrb[51].mxu1 }
 0x6ba   : > { %v2242_v19 = vadd.f32 %v4521_v52, %v2241_v54  ;;  %v2333_v54 = vpop.trf.xlu1 }
 0x6bc   : > { %v4251_v16 = vpack.c.bf16 %v2247_v26, %v2242_v19 }
 0x6be   : > { %4252 = vmatprep.subr.bf16.mxu0 %v4251_v16 }
 0x6bf   : > { %4254 = vmatpush3.bf16.msra.mxu0 %v4251_v16 }
 0x6c0   : > { %v3831_v40 = vpop.f32.mrb[52].mxu1 }
 0x6c1   : > { %v2257_v32 = vadd.f32 %v4521_v52, %v3831_v40  ;;  %v2251_v14 = vpop.f32.mrb[53].mxu1 }
 0x6c2   : > { %v2252_v30 = vadd.f32 %v4521_v52, %v2251_v14  ;;  %v2334_v14 = vpop.trf.xlu1 }
 0x6c4   : > { %v4255_v18 = vpack.c.bf16 %v2257_v32, %v2252_v30 }
 0x6c6   : > { %4256 = vmatprep.subr.bf16.mxu0 %v4255_v18 }
 0x6c7   : > { %4258 = vmatpush3.bf16.msra.mxu0 %v4255_v18 }
 0x6c8   : > { %v3834_v13 = vpop.f32.mrb[54].mxu1 }
 0x6c9   : > { %v2267_v44 = vadd.f32 %v4521_v52, %v3834_v13  ;;  %v2261_v28 = vpop.f32.mrb[55].mxu1  ;;  %v2335_v13 = vpop.trf.xlu1 }
 0x6ca   : > { %v2262_v29 = vadd.f32 %v4521_v52, %v2261_v28 }
 0x6cc   : > { %v4259_v47 = vpack.c.bf16 %v2267_v44, %v2262_v29 }
 0x6ce   : > { %4260 = vmatprep.subr.bf16.mxu0 %v4259_v47 }
 0x6cf   : > { %4262 = vmatpush3.bf16.msra.mxu0 %v4259_v47 }
 0x6d0   : > { %v3837_v15 = vpop.f32.mrb[56].mxu1 }
 0x6d1   : > { %v2277_v61 = vadd.f32 %v4521_v52, %v3837_v15  ;;  %v2271_v22 = vpop.f32.mrb[57].mxu1 }
 0x6d2   : > { %v2272_v4 = vadd.f32 %v4521_v52, %v2271_v22 }
 0x6d4   : > { %v4263_v2 = vpack.c.bf16 %v2277_v61, %v2272_v4  ;;  %v2336_v61 = vpop.trf.xlu1 }
 0x6d6   : > { %4264 = vmatprep.subr.bf16.mxu0 %v4263_v2 }
 0x6d7   : > { %4266 = vmatpush3.bf16.msra.mxu0 %v4263_v2 }
 0x6d8   : > { %v3840_v6 = vpop.f32.mrb[58].mxu1  ;;  %v2337_v22 = vpop.trf.xlu1 }
 0x6d9   : > { %v2287_v34 = vadd.f32 %v4521_v52, %v3840_v6  ;;  %v2281_v10 = vpop.f32.mrb[59].mxu1 }
 0x6da   : > { %v2282_v26 = vadd.f32 %v4521_v52, %v2281_v10 }
 0x6dc   : > { %v4267_v19 = vpack.c.bf16 %v2287_v34, %v2282_v26  ;;  %v2338_v4 = vpop.trf.xlu1 }
 0x6de   : > { %4268 = vmatprep.subr.bf16.mxu0 %v4267_v19 }
 0x6df   : > { %4270 = vmatpush3.bf16.msra.mxu0 %v4267_v19 }
 0x6e0   : > { %v3843_v16 = vpop.f32.mrb[60].mxu1  ;;  %v2339_v2 = vpop.trf.xlu1 }
 0x6e1   : > { %v2297_v40 = vadd.f32 %v4521_v52, %v3843_v16  ;;  %v2291_v32 = vpop.f32.mrb[61].mxu1 }
 0x6e2   : > { %v2292_v30 = vadd.f32 %v4521_v52, %v2291_v32 }
 0x6e4   : > { %v4271_v18 = vpack.c.bf16 %v2297_v40, %v2292_v30  ;;  %v2340_v6 = vpop.trf.xlu1 }
 0x6e6   : > { %4272 = vmatprep.subr.bf16.mxu0 %v4271_v18 }
 0x6e7   : > { %4274 = vmatpush3.bf16.msra.mxu0 %v4271_v18 }
 0x6e8   : > { %v3846_v44 = vpop.f32.mrb[62].mxu1 }
 0x6e9   : > { %v2307_v28 = vadd.f32 %v4521_v52, %v3846_v44  ;;  %v2301_v29 = vpop.f32.mrb[63].mxu1 }
 0x6ea   : > { %v2302_v47 = vadd.f32 %v4521_v52, %v2301_v29  ;;  %v2341_v52 = vpop.trf.xlu1 }
 0x6ec   : > { %v4275_v15 = vpack.c.bf16 %v2307_v28, %v2302_v47 }
 0x6ee   : > { %4276 = vmatprep.subr.bf16.mxu0 %v4275_v15 }
 0x6ef   : > { %4278 = vmatpush3.bf16.msra.mxu0 %v4275_v15 }
 0x6f2   : > { %3880 = vmatmul.mubr.f32.vlgmr.msra.gmra.mrb[64].mxu0 %v2327_v36 }
 0x6f3   : > { %3882 = vmatprep.mubr.f32.mxu0 %v2328_v46 }
 0x6f6   : > { %3883 = vmatmul.mubr.f32.gmra.mrb[66].mxu0 %v2329_v7 }
 0x6f7   : > { %3885 = vmatprep.mubr.f32.mxu0 %v2330_v11 }
 0x6fa   : > { %3886 = vmatmul.mubr.f32.gmra.mrb[68].mxu0 %v2331_v8 }
 0x6fb   : > { %3888 = vmatprep.mubr.f32.mxu0 %v2332_v25 }
 0x6fe   : > { %3889 = vmatmul.mubr.f32.gmra.mrb[70].mxu0 %v2333_v54 }
 0x6ff   : > { %3891 = vmatprep.mubr.f32.mxu0 %v2334_v14 }
 0x702   : > { %3892 = vmatmul.mubr.f32.gmra.mrb[72].mxu0 %v2335_v13 }
 0x703   : > { %3894 = vmatprep.mubr.f32.mxu0 %v2336_v61 }
 0x706   : > { %3895 = vmatmul.mubr.f32.gmra.mrb[74].mxu0 %v2337_v22 }
 0x707   : > { %3897 = vmatprep.mubr.f32.mxu0 %v2338_v4 }
 0x70a   : > { %3898 = vmatmul.mubr.f32.gmra.mrb[76].mxu0 %v2339_v2 }
 0x70b   : > { %3900 = vmatprep.mubr.f32.mxu0 %v2340_v6 }
 0x70e   : > { %3901 = vmatmul.mubr.f32.gmra.mrb[78].mxu0 %v2341_v52 }
 0x7c5   : > { %v3881_v36 = vpop.f32.mrb[64].mxu0 }
 0x7c6   : > { %v2408_v46 = vpop.f32.mrb[65].mxu0  ;;  %v2488_v11 = vsub.f32 %v5746_v59, %v3881_v36 }
 0x7c7   : > { %v2487_v7 = vsub.f32 %v5751_v48, %v2408_v46 }
 0x7c9   : > { %v3884_v8 = vpop.f32.mrb[66].mxu0  ;;  %3935 = vmatprep.mubr.f32.mxu1 %v2487_v7 }
 0x7ca   : > { %v2418_v25 = vpop.f32.mrb[67].mxu0  ;;  %3936 = vmatmul.mubr.f32.vlgmr.msra.gmra.mrb[64].mxu1 %v2488_v11  ;;  %v2490_v10 = vsub.f32 %v5767_v35, %v3884_v8 }
 0x7cb   : > { %v2489_v34 = vsub.f32 %v5771_v51, %v2418_v25 }
 0x7cd   : > { %v3887_v26 = vpop.f32.mrb[68].mxu0  ;;  %3938 = vmatprep.mubr.f32.mxu1 %v2489_v34 }
 0x7ce   : > { %v2428_v54 = vpop.f32.mrb[69].mxu0  ;;  %3939 = vmatmul.mubr.f32.gmra.mrb[66].mxu1 %v2490_v10  ;;  %v2492_v16 = vsub.f32 %v5789_v9, %v3887_v26 }
 0x7cf   : > { %v2491_v19 = vsub.f32 %v5793_v38, %v2428_v54 }
 0x7d1   : > { %v3890_v40 = vpop.f32.mrb[70].mxu0  ;;  %3941 = vmatprep.mubr.f32.mxu1 %v2491_v19 }
 0x7d2   : > { %v2438_v48 = vpop.f32.mrb[71].mxu0  ;;  %3942 = vmatmul.mubr.f32.gmra.mrb[68].mxu1 %v2492_v16  ;;  %v2494_v32 = vsub.f32 %v5811_v31, %v3890_v40 }
 0x7d3   : > { %v2493_v59 = vsub.f32 %v5815_v3, %v2438_v48 }
 0x7d5   : > { %v3893_v14 = vpop.f32.mrb[72].mxu0  ;;  %3944 = vmatprep.mubr.f32.mxu1 %v2493_v59 }
 0x7d6   : > { %v2448_v51 = vpop.f32.mrb[73].mxu0  ;;  %3945 = vmatmul.mubr.f32.gmra.mrb[70].mxu1 %v2494_v32  ;;  %v2496_v30 = vsub.f32 %v5833_v39, %v3893_v14 }
 0x7d7   : > { %v2495_v35 = vsub.f32 %v5837_v24, %v2448_v51 }
 0x7d9   : > { %v3896_v18 = vpop.f32.mrb[74].mxu0  ;;  %3947 = vmatprep.mubr.f32.mxu1 %v2495_v35 }
 0x7da   : > { %v2458_v38 = vpop.f32.mrb[75].mxu0  ;;  %3948 = vmatmul.mubr.f32.gmra.mrb[72].mxu1 %v2496_v30  ;;  %v2498_v13 = vsub.f32 %v5852_v60, %v3896_v18 }
 0x7db   : > { %v2497_v9 = vsub.f32 %v5856_v37, %v2458_v38 }
 0x7dd   : > { %v3899_v3 = vpop.f32.mrb[76].mxu0  ;;  %3950 = vmatprep.mubr.f32.mxu1 %v2497_v9 }
 0x7de   : > { %v2468_v31 = vpop.f32.mrb[77].mxu0  ;;  %3951 = vmatmul.mubr.f32.gmra.mrb[74].mxu1 %v2498_v13  ;;  %v2500_v39 = vsub.f32 %v5870_v12, %v3899_v3 }
 0x7df   : > { %v2499_v24 = vsub.f32 %v5874_v50, %v2468_v31 }
 0x7e1   : > { %v3902_v44 = vpop.f32.mrb[78].mxu0  ;;  %3953 = vmatprep.mubr.f32.mxu1 %v2499_v24 }
 0x7e2   : > { %v2478_v28 = vpop.f32.mrb[79].mxu0  ;;  %3954 = vmatmul.mubr.f32.gmra.mrb[76].mxu1 %v2500_v39  ;;  %v2502_v60 = vsub.f32 %v5887_v5, %v3902_v44 }
 0x7e3   : > { %v2501_v37 = vsub.f32 %v5890_v62, %v2478_v28 }
 0x7e5   : > { %3956 = vmatprep.mubr.f32.mxu1 %v2501_v37 }
 0x7e6   : > { %3957 = vmatmul.mubr.f32.gmra.mrb[78].mxu1 %v2502_v60 }
 0x7e7   : > { %4535 = shalt.err (!%p4532_p3)
}
 0x7e8   : > { %s4536_s23 = scalar_lea.hbm %s5924_s16, 2048  ;;  %s4540_s19 = scalar_lea.hbm %s6106_s11, 4096 }
 0x7e9   : > { %p4537_p4 = scmp.ne.s32.totalorder %s5924_s16, %s4536_s23  ;;  %p4541_p9 = scmp.lt.u32.totalorder %s5924_s16, %s6106_s11 }
 0x7ea   : > { %p4542_p10 = scmp.lt.u32.totalorder %s4540_s19, %s4536_s23  ;;  %p4544_p12 = scmp.lt.u32.totalorder %s4536_s23, %s5924_s16 }
 0x7eb   : > { %p4538_p7 = pnand %p4537_p4, %p4725_p5 }
 0x7ec   : > { %p4543_p11 = por %p4542_p10, %p4541_p9 }
 0x7ed   : > { %p4539_p8 = pneg %p4538_p7 }
 0x7ee   : > { %p4545_p13 = por %p4544_p12, %p4543_p11 }
 0x7f0   : > { %p4546_p0 = pnand %p4545_p13, %p4539_p8 }
 0x7f2   : > { %4549 = shalt.err (!%p4546_p0)
}
 0x7f3   : > { %s4619_s17 = smov 128   ;;  %s4620_s26 = smov 8  }
 0x7f4   : > { %s6128_s0 = scalar_lea.sflag [#allocation3], %s5391_s28  ;;  %s6129_s29 = sshll.u32 %s4708_s25, 11 }
 0x7f5   : > { %4311 = dma.vmem_to_hbm [thread:$0]  (%p4725_p5), %s5926_s20, 2048, %s5924_s16, %s6128_s0, %s4619_s17, %s4619_s17, %s4620_s26  }
 0x7f6   : > { %s5960_s19 = scalar_lea.hbm %s6107_s12, %s6129_s29  ;;  %s2827_s30 = sshll.u32 %s5636_s1, 4  ;;  %s5963_s30 = int_to_ptr.vmem [resolvable:$true] %s2827_s30 }
 0x7f7   : > { %s2792_s2 = scalar_lea.sflag [#allocation5], %s5391_s28  ;;  %s4550_s3 = scalar_lea.vmem %s5963_s30, 2048 }
 0x7f8   : > { %p4551_p1 = scmp.ne.s32.totalorder %s5963_s30, %s4550_s3  ;;  %s4621_s4 = smov [#allocation4]  }
 0x7f9   : > { %s4554_s20 = sshll.u32 %s4621_s4, 4  ;;  %s4555_s20 = int_to_ptr.vmem [resolvable:$false] %s4554_s20 }
 0x7fa   : > { %p4552_p2 = pnand %p4551_p1, %p4725_p5  ;;  %s4556_s25 = scalar_lea.vmem %s4555_s20, 4096 }
 0x7fb   : > { %p4557_p4 = scmp.lt.s32.totalorder %s5963_s30, %s4555_s20  ;;  %p4558_p7 = scmp.lt.s32.totalorder %s4556_s25, %s4550_s3 }
 0x7fc   : > { %p4553_p3 = pneg %p4552_p2 }
 0x7fd   : > { %p4559_p8 = por %p4558_p7, %p4557_p4 }
 0x7ff   : > { %p4560_p9 = pnand %p4559_p8, %p4553_p3 }
 0x801   : > { %4563 = shalt.err (!%p4560_p9)
}
 0x802   : > { %s4564_s1 = scalar_lea.hbm %s5960_s19, 2048  ;;  %s4568_s4 = scalar_lea.hbm %s6107_s12, 4096 }
 0x803   : > { %p4565_p10 = scmp.ne.s32.totalorder %s5960_s19, %s4564_s1  ;;  %p4569_p13 = scmp.lt.u32.totalorder %s5960_s19, %s6107_s12 }
 0x804   : > { %p4570_p0 = scmp.lt.u32.totalorder %s4568_s4, %s4564_s1  ;;  %p4572_p2 = scmp.lt.u32.totalorder %s4564_s1, %s5960_s19 }
 0x805   : > { %p4566_p11 = pnand %p4565_p10, %p4725_p5 }
 0x806   : > { %p4571_p1 = por %p4570_p0, %p4569_p13 }
 0x807   : > { %p4567_p12 = pneg %p4566_p11 }
 0x808   : > { %p4573_p3 = por %p4572_p2, %p4571_p1 }
 0x80a   : > { %p4574_p4 = pnand %p4573_p3, %p4567_p12 }
 0x80c   : > { %4577 = shalt.err (!%p4574_p4)
}
 0x80d   : > { %4312 = dma.vmem_to_hbm [thread:$0]  (%p4725_p5), %s5963_s30, 2048, %s5960_s19, %s2792_s2, %s4619_s17, %s4619_s17, %s4620_s26  }
 0x80e   : > { %s6005_s13 = scalar_lea.vmem %s6105_s10, %s4755_s18 }
 0x89d   : > { %v3937_v12 = vpop.f32.mrb[64].mxu1 }
 0x89e   : > { %v2575_v50 = vadd.f32 %v3937_v12, %v5721_v41  ;;  %v2569_v5 = vpop.f32.mrb[65].mxu1 }
 0x89f   : > { %v2570_v62 = vadd.f32 %v5721_v41, %v2569_v5 }
 0x8a0   : > { %v2649_v29 = vmul.f32 %v5726_v45, %v2575_v50 }
 0x8a1   : > { %v2648_v47 = vmul.f32 %v5726_v45, %v2570_v62  ;;  %v3940_v15 = vpop.f32.mrb[66].mxu1 }
 0x8a2   : > { %v2665_v61 = vadd.f32 %v5732_v43, %v2649_v29  ;;  %v2585_v22 = vadd.f32 %v3940_v15, %v5721_v41  ;;  %v2579_v4 = vpop.f32.mrb[67].mxu1 }
 0x8a3   : > { %v2664_v2 = vadd.f32 %v5732_v43, %v2648_v47  ;;  %v2580_v6 = vadd.f32 %v5721_v41, %v2579_v4 }
 0x8a4   : > { %v2681_v52 = vmax.f32 %v2665_v61, 0.0  ;;  %v2651_v36 = vmul.f32 %v5726_v45, %v2585_v22 }
 0x8a5   : > { %v2680_v46 = vmax.f32 %v2664_v2, 0.0  ;;  %v2650_v7 = vmul.f32 %v5726_v45, %v2580_v6  ;;  %v3943_v11 = vpop.f32.mrb[68].mxu1 }
 0x8a6   : > { %v2697_v8 = vadd.f32 %v5659_v56, %v2681_v52  ;;  %v2667_v25 = vadd.f32 %v5732_v43, %v2651_v36  ;;  %v2595_v34 = vadd.f32 %v3943_v11, %v5721_v41  ;;  %v2589_v10 = vpop.f32.mrb[69].mxu1 }
 0x8a7   : > { %v2696_v26 = vadd.f32 %v5655_v55, %v2680_v46  ;;  %v2666_v54 = vadd.f32 %v5732_v43, %v2650_v7  ;;  %v2590_v19 = vadd.f32 %v5721_v41, %v2589_v10 }
 0x8a8   : > { %2729 = vst [vmem:[%s6005_s13 + $0x8] sm:$0xff] %v2697_v8  ;;  %v2683_v16 = vmax.f32 %v2667_v25, 0.0  ;;  %v2653_v40 = vmul.f32 %v5726_v45, %v2595_v34 }
 0x8a9   : > { %2728 = vst [vmem:[%s6005_s13] sm:$0xff] %v2696_v26  ;;  %v2682_v48 = vmax.f32 %v2666_v54, 0.0  ;;  %v2652_v56 = vmul.f32 %v5726_v45, %v2590_v19  ;;  %v3946_v59 = vpop.f32.mrb[70].mxu1 }
 0x8aa   : > { %v2699_v32 = vadd.f32 %v5667_v17, %v2683_v16  ;;  %v2669_v14 = vadd.f32 %v5732_v43, %v2653_v40  ;;  %v2605_v55 = vadd.f32 %v3946_v59, %v5721_v41  ;;  %v2599_v51 = vpop.f32.mrb[71].mxu1 }
 0x8ab   : > { %v2698_v35 = vadd.f32 %v5663_v27, %v2682_v48  ;;  %v2668_v30 = vadd.f32 %v5732_v43, %v2652_v56  ;;  %v2600_v18 = vadd.f32 %v5721_v41, %v2599_v51 }
 0x8ac   : > { %2731 = vst [vmem:[%s6005_s13 + $0x18] sm:$0xff] %v2699_v32  ;;  %v2685_v38 = vmax.f32 %v2669_v14, 0.0  ;;  %v2655_v9 = vmul.f32 %v5726_v45, %v2605_v55 }
 0x8ad   : > { %2730 = vst [vmem:[%s6005_s13 + $0x10] sm:$0xff] %v2698_v35  ;;  %v2684_v13 = vmax.f32 %v2668_v30, 0.0  ;;  %v2654_v17 = vmul.f32 %v5726_v45, %v2600_v18  ;;  %v3949_v3 = vpop.f32.mrb[72].mxu1 }
 0x8ae   : > { %v2701_v31 = vadd.f32 %v5675_v42, %v2685_v38  ;;  %v2671_v24 = vadd.f32 %v5732_v43, %v2655_v9  ;;  %v2615_v27 = vadd.f32 %v3949_v3, %v5721_v41  ;;  %v2609_v39 = vpop.f32.mrb[73].mxu1 }
 0x8af   : > { %v2700_v44 = vadd.f32 %v5671_v49, %v2684_v13  ;;  %v2670_v28 = vadd.f32 %v5732_v43, %v2654_v17  ;;  %v2610_v37 = vadd.f32 %v5721_v41, %v2609_v39 }
 0x8b0   : > { %2733 = vst [vmem:[%s6005_s13 + $0x28] sm:$0xff] %v2701_v31  ;;  %v2687_v60 = vmax.f32 %v2671_v24, 0.0  ;;  %v2657_v12 = vmul.f32 %v5726_v45, %v2615_v27 }
 0x8b1   : > { %2732 = vst [vmem:[%s6005_s13 + $0x20] sm:$0xff] %v2700_v44  ;;  %v2686_v50 = vmax.f32 %v2670_v28, 0.0  ;;  %v2656_v42 = vmul.f32 %v5726_v45, %v2610_v37  ;;  %v3952_v5 = vpop.f32.mrb[74].mxu1 }
 0x8b2   : > { %v2703_v62 = vadd.f32 %v5683_v20, %v2687_v60  ;;  %v2673_v29 = vadd.f32 %v5732_v43, %v2657_v12  ;;  %v2625_v49 = vadd.f32 %v3952_v5, %v5721_v41  ;;  %v2619_v47 = vpop.f32.mrb[75].mxu1 }
 0x8b3   : > { %v2702_v15 = vadd.f32 %v5679_v63, %v2686_v50  ;;  %v2672_v61 = vadd.f32 %v5732_v43, %v2656_v42  ;;  %v2620_v22 = vadd.f32 %v5721_v41, %v2619_v47 }
 0x8b4   : > { %2735 = vst [vmem:[%s6005_s13 + $0x38] sm:$0xff] %v2703_v62  ;;  %v2689_v4 = vmax.f32 %v2673_v29, 0.0  ;;  %v2659_v2 = vmul.f32 %v5726_v45, %v2625_v49 }
 0x8b5   : > { %2734 = vst [vmem:[%s6005_s13 + $0x30] sm:$0xff] %v2702_v15  ;;  %v2688_v6 = vmax.f32 %v2672_v61, 0.0  ;;  %v2658_v20 = vmul.f32 %v5726_v45, %v2620_v22  ;;  %v3955_v52 = vpop.f32.mrb[76].mxu1 }
 0x8b6   : > { %v2705_v36 = vadd.f32 %v5691_v0, %v2689_v4  ;;  %v2675_v46 = vadd.f32 %v5732_v43, %v2659_v2  ;;  %v2635_v63 = vadd.f32 %v3955_v52, %v5721_v41  ;;  %v2629_v7 = vpop.f32.mrb[77].mxu1 }
 0x8b7   : > { %v2704_v11 = vadd.f32 %v5687_v21, %v2688_v6  ;;  %v2674_v8 = vadd.f32 %v5732_v43, %v2658_v20  ;;  %v2630_v25 = vadd.f32 %v5721_v41, %v2629_v7 }
 0x8b8   : > { %2737 = vst [vmem:[%s6005_s13 + $0x48] sm:$0xff] %v2705_v36  ;;  %v2691_v34 = vmax.f32 %v2675_v46, 0.0  ;;  %v2661_v10 = vmul.f32 %v5726_v45, %v2635_v63 }
 0x8b9   : > { %2736 = vst [vmem:[%s6005_s13 + $0x40] sm:$0xff] %v2704_v11  ;;  %v2690_v26 = vmax.f32 %v2674_v8, 0.0  ;;  %v2660_v0 = vmul.f32 %v5726_v45, %v2630_v25  ;;  %v3958_v54 = vpop.f32.mrb[78].mxu1 }
 0x8ba   : > { %v2707_v19 = vadd.f32 %v5699_v23, %v2691_v34  ;;  %v2677_v16 = vadd.f32 %v5732_v43, %v2661_v10  ;;  %v2645_v21 = vadd.f32 %v3958_v54, %v5721_v41  ;;  %v2639_v40 = vpop.f32.mrb[79].mxu1 }
 0x8bb   : > { %v2706_v48 = vadd.f32 %v5695_v1, %v2690_v26  ;;  %v2676_v56 = vadd.f32 %v5732_v43, %v2660_v0  ;;  %v2640_v59 = vadd.f32 %v5721_v41, %v2639_v40 }
 0x8bc   : > { %2739 = vst [vmem:[%s6005_s13 + $0x58] sm:$0xff] %v2707_v19  ;;  %v2693_v32 = vmax.f32 %v2677_v16, 0.0  ;;  %v2663_v14 = vmul.f32 %v5726_v45, %v2645_v21 }
 0x8bd   : > { %2738 = vst [vmem:[%s6005_s13 + $0x50] sm:$0xff] %v2706_v48  ;;  %v2692_v23 = vmax.f32 %v2676_v56, 0.0  ;;  %v2662_v55 = vmul.f32 %v5726_v45, %v2640_v59 }
 0x8be   : > { %v2709_v51 = vadd.f32 %v5707_v58, %v2693_v32  ;;  %v2679_v35 = vadd.f32 %v5732_v43, %v2663_v14 }
 0x8bf   : > { %v2708_v1 = vadd.f32 %v5703_v53, %v2692_v23  ;;  %v2678_v30 = vadd.f32 %v5732_v43, %v2662_v55 }
 0x8c0   : > { %2741 = vst [vmem:[%s6005_s13 + $0x68] sm:$0xff] %v2709_v51  ;;  %v2695_v41 = vmax.f32 %v2679_v35, 0.0 }
 0x8c1   : > { %2740 = vst [vmem:[%s6005_s13 + $0x60] sm:$0xff] %v2708_v1  ;;  %v2694_v18 = vmax.f32 %v2678_v30, 0.0 }
 0x8c2   : > { %v2711_v38 = vadd.f32 %v5715_v33, %v2695_v41 }
 0x8c3   : > { %v2710_v9 = vadd.f32 %v5711_v57, %v2694_v18 }
 0x8c4   : > { %2743 = vst [vmem:[%s6005_s13 + $0x78] sm:$0xff] %v2711_v38 }
 0x8c5   : > { %2742 = vst [vmem:[%s6005_s13 + $0x70] sm:$0xff] %v2710_v9 }
 0x8c6 PF: > { %p4322_p5 = scmp.ge.s32.totalorder %s4616_s24, 2  ;;  %s2858_s18 = sand.u32 1, %s4604_s21  }
 0x8c7   : > { %s2859_s28 = scalar_lea.sflag [#allocation3], %s2858_s18 }
 0x8c8   : > { %p4316_p7 = pnand %p4322_p5, %p4729_p6 }
 0x8ca   : > { %4595 = dma.done.wait (!%p4316_p7), %s2859_s28, 2048  }
 0x8cb   : > { %4597 = vsyncadd (!%p4316_p7), %s2859_s28, 4294965248  ;;  %s2868_s17 = scalar_lea.sflag [#allocation5], %s2858_s18 }
 0x8cc   : > { %4599 = dma.done.wait (!%p4316_p7), %s2868_s17, 2048  }
 0x8cd   : > { %4601 = vsyncadd (!%p4316_p7), %s2868_s17, 4294965248  ;;  %s6130_s26 = sld [smem:[#allocation8_spill]]  ;;  %s6131_s23 = sld [smem:[#allocation9_spill]] }
 0x8ce   : > { %p26_p8 = scmp.ge.s32.totalorder %s4712_s27, 4   ;;  %s6132_s21 = smov %s4608_s22 }
 0x8cf   : > { %s6134_s24 = smov %s4712_s27 }
 0x8d0   :  { %28 = sbr.rel (!%p26_p8) target bundleno = 11 (0xb), region = 135 }
 0x8d3   : > { %s6133_s22 = smov %s6130_s26 }
 0x8d7   :  { %2873 = vsyncpa [#allocation3], 1 }
 0x8d8   :  { %2875 = vsyncpa [#allocation3 + $0x1], 1 }
 0x8d9   :  { %2876 = vsyncpa [#allocation5], 1 }
 0x8da   :  { %2878 = vsyncpa [#allocation5 + $0x1], 1 }

</bundles_post_ra>
